<compile_context>
chip_gen: v6e
topology: v6e:2x2x1
jax: 0.10.0
libtpu: 0.0.40
codegen_flags: <defaults>
</compile_context>

<pallas_src>
import functools

import jax
import jax.numpy as jnp
from jax import lax
from jax.experimental import pallas as pl
from jax.experimental.pallas import tpu as pltpu


def _round_up(x, m):
    return (x + m - 1) // m * m


def _cdiv(a, b):
    return -(-a // b)


def _vmem_capacity_bytes():
    """Physical per-core VMEM; conservative 64 MiB fallback (v7x-safe)."""
    try:
        info = pltpu.get_tpu_info()
        cap = getattr(info, "vmem_capacity_bytes", None)
        if cap:
            return int(cap)
    except Exception:
        pass
    return 64 << 20


# --------------------------------- kernel ---------------------------------
def idec_kernel(x_ref,
                w1, w2, w3, w4, w5, w6, w7, w8,
                b_ref, ct_ref, c2_ref,
                xbar_ref, q_ref,
                *, alpha, out_dims, n_clusters, mxu_dtype):
    """One batch tile: full encoder + decoder + Student-t q.

    x_ref:   (TB, n_input_pad)    bf16 (pre-cast in wrapper)
    w*:      (in_pad, out_pad)    bf16, VMEM-resident, single-buffered
    b_ref:   (8, max_out_pad)     f32, all biases packed (zero-padded)
    ct_ref:  (n_z_pad, K_pad)     f32, clusters pre-transposed
    c2_ref:  (1, K_pad)           f32, precomputed ||c_j||^2
    """
    ws = (w1, w2, w3, w4, w5, w6, w7, w8)

    def linear(h, layer, relu, cast_out):
        o = out_dims[layer]
        # MXU: bf16 x bf16 -> f32 accumulate.  Bias add / ReLU in f32 (VPU).
        y = jnp.dot(h, ws[layer][...], preferred_element_type=jnp.float32)
        y = y + b_ref[layer:layer + 1, :o]            # (1, o) broadcast, f32
        if relu:
            y = jnp.maximum(y, 0.0)
        # carry activations in bf16 between layers (halves live bytes/vregs)
        return y.astype(mxu_dtype) if cast_out else y

    x = x_ref[...]                                     # (TB, n_input_pad) bf16

    # ---- encoder ----
    h = linear(x, 0, True, True)
    h = linear(h, 1, True, True)
    h = linear(h, 2, True, True)
    z = linear(h, 3, False, False)                     # (TB, n_z_pad) f32

    # ---- decoder ----
    h = linear(z.astype(mxu_dtype), 4, True, True)
    h = linear(h, 5, True, True)
    h = linear(h, 6, True, True)
    xbar_ref[...] = linear(h, 7, False, False)         # f32 output

    # ---- Student-t cluster assignment q ----
    # ||z_i - c_j||^2 = ||z||^2 + ||c||^2 - 2 z.c  (||c||^2 precomputed).
    # z @ c^T kept in f32 for fidelity (n_z / K are tiny -> negligible cost).
    ct = ct_ref[...]                                   # (n_z_pad, K_pad) f32
    z2 = jnp.sum(z * z, axis=1, keepdims=True)         # (TB, 1)
    zc = jnp.dot(z, ct, preferred_element_type=jnp.float32)   # (TB, K_pad)
    dist = jnp.maximum(z2 + c2_ref[...] - 2.0 * zc, 0.0)

    q = pl.reciprocal(1.0 + dist * (1.0 / alpha), approx=True)  # EUP, free slot
    if alpha != 1.0:                                   # trace-time constant
        q = q ** ((alpha + 1.0) / 2.0)                 # alpha==1 -> identity

    # mask padded cluster columns so they do not pollute the row sum
    col = lax.broadcasted_iota(jnp.int32, q.shape, 1)
    q = jnp.where(col < n_clusters, q, 0.0)
    # exact normalization (rows must sum to 1 for the downstream KL loss)
    q_ref[...] = q / jnp.sum(q, axis=1, keepdims=True)


# --------------------------------- wrapper ---------------------------------
def idec_forward(x, lin_params, clusters, alpha=1.0,
                 mxu_dtype=jnp.bfloat16, block_b=512):
    """lin_params: list of 8 (W(in,out), b(out,)) tuples in AE layer order.
    clusters: (n_clusters, n_z).  Returns (x_bar, q)."""
    B, n_input = x.shape
    n_clusters, n_z = clusters.shape

    dims_in = [w.shape[0] for w, _ in lin_params]
    dims_out = [w.shape[1] for w, _ in lin_params]
    in_pad = [_round_up(d, 128) for d in dims_in]
    out_pad = [_round_up(d, 128) for d in dims_out]
    n_input_pad = in_pad[0]
    nz_pad = out_pad[3]
    k_pad = _round_up(n_clusters, 128)
    max_pad = max(max(in_pad), max(out_pad))
    itemsize = jnp.dtype(mxu_dtype).itemsize

    # ---- grid-invariant operands, padded once in the wrapper ----
    w_padded = []
    max_out = max(out_pad)
    b_packed = jnp.zeros((8, max_out), jnp.float32)
    for li, (w, b) in enumerate(lin_params):
        wp = jnp.zeros((in_pad[li], out_pad[li]), jnp.float32)
        wp = wp.at[:w.shape[0], :w.shape[1]].set(w)
        w_padded.append(wp.astype(mxu_dtype))            # bf16 weights in VMEM
        b_packed = b_packed.at[li, :b.shape[0]].set(b)    # biases stay f32

    ct = jnp.zeros((nz_pad, k_pad), jnp.float32)
    ct = ct.at[:n_z, :n_clusters].set(clusters.T)         # pre-transposed, f32
    c2 = jnp.zeros((1, k_pad), jnp.float32)
    c2 = c2.at[0, :n_clusters].set(jnp.sum(clusters * clusters, axis=1))

    # ---- generation-aware VMEM budget ----
    vmem_cap = int(_vmem_capacity_bytes() * 0.80)   # ~51 MiB v7x, ~102 MiB v5e/v6e
    resident = (sum(int(wp.size) * itemsize for wp in w_padded)  # single-buffered
                + b_packed.size * 4 + ct.size * 4 + c2.size * 4)

    # ---- batch tile: balanced, multiple of 16, >=4 steps when B allows ----
    n_steps = max(_cdiv(B, block_b), max(1, min(4, B // 16)))
    TB = _round_up(_cdiv(B, n_steps), 16)
    per_row = (2 * n_input_pad * itemsize          # x tile, double-buffered
               + 2 * (n_input_pad + k_pad) * 4     # x_bar + q, double-buffered
               + 6 * max_pad * 4)                  # live activations (rough)
    tb_cap = max(16, int((vmem_cap - resident - (4 << 20)) // per_row) // 16 * 16)
    TB = int(min(TB, tb_cap))
    B_pad = _round_up(B, TB)
    grid = (B_pad // TB,)

    # x pre-cast to bf16 (halves input DMA bytes and its double buffer)
    x_p = jnp.zeros((B_pad, n_input_pad), mxu_dtype)
    x_p = x_p.at[:B, :n_input].set(x.astype(mxu_dtype))

    out_specs = (
        pl.BlockSpec((TB, n_input_pad), lambda i: (i, 0)),
        pl.BlockSpec((TB, k_pad), lambda i: (i, 0)),
    )
    kernel = functools.partial(
        idec_kernel, alpha=float(alpha), out_dims=tuple(out_pad),
        n_clusters=int(n_clusters), mxu_dtype=mxu_dtype)
    out_shape = (
        jax.ShapeDtypeStruct((B_pad, n_input_pad), jnp.float32),
        jax.ShapeDtypeStruct((B_pad, k_pad), jnp.float32),
    )

    def build_and_call(single_buffer_weights):
        pm = ({"pipeline_mode": pl.Buffered(1)} if single_buffer_weights else {})
        in_specs = [pl.BlockSpec((TB, n_input_pad), lambda i: (i, 0))]
        for wp in w_padded:                               # resident weights
            in_specs.append(pl.BlockSpec(wp.shape, lambda i: (0, 0), **pm))
        in_specs.append(pl.BlockSpec(b_packed.shape, lambda i: (0, 0), **pm))
        in_specs.append(pl.BlockSpec(ct.shape, lambda i: (0, 0), **pm))
        in_specs.append(pl.BlockSpec(c2.shape, lambda i: (0, 0), **pm))

        res = resident if single_buffer_weights else 2 * resident
        vmem_limit = int(max(32 << 20,
                             min(res + TB * per_row + (4 << 20), vmem_cap)))

        out = pl.pallas_call(
            kernel,
            out_shape=out_shape,
            grid=grid,
            in_specs=in_specs,
            out_specs=out_specs,
            compiler_params=pltpu.CompilerParams(
                dimension_semantics=("parallel",),
                vmem_limit_bytes=vmem_limit),
        )(x_p, *w_padded, b_packed, ct, c2)
        jax.block_until_ready(out)
        return out

    try:
        xbar_p, q_p = build_and_call(True)     # single-buffered invariants
    except Exception:
        xbar_p, q_p = build_and_call(False)    # fallback: default 2-deep

    return xbar_p[:B, :n_input], q_p[:B, :n_clusters]


# ------------------- pure-JAX reference (same precision) -------------------
def idec_reference(x, lin_params, clusters, alpha=1.0,
                   mxu_dtype=jnp.bfloat16):
    def lin(h, w, b, relu):
        y = jnp.dot(h.astype(mxu_dtype), w.astype(mxu_dtype),
                    preferred_element_type=jnp.float32) + b
        return jnp.maximum(y, 0.0) if relu else y

    h = x
    for i in range(3):
        h = lin(h, lin_params[i][0], lin_params[i][1], True)
    z = lin(h, lin_params[3][0], lin_params[3][1], False)
    h = z
    for i in range(4, 7):
        h = lin(h, lin_params[i][0], lin_params[i][1], True)
    x_bar = lin(h, lin_params[7][0], lin_params[7][1], False)

    dist = jnp.sum((z[:, None, :] - clusters[None, :, :]) ** 2, axis=2)
    q = 1.0 / (1.0 + dist / alpha)
    q = q ** ((alpha + 1.0) / 2.0)
    q = q / jnp.sum(q, axis=1, keepdims=True)
    return x_bar, q


# ----------------- deterministic parameter construction -----------------
def init_linear(key, n_in, n_out):
    """Mimics torch.nn.Linear default init (uniform +/- 1/sqrt(fan_in))."""
    kw, kb = jax.random.split(key)
    bound = 1.0 / (n_in ** 0.5)
    w = jax.random.uniform(kw, (n_in, n_out), jnp.float32, -bound, bound)
    b = jax.random.uniform(kb, (n_out,), jnp.float32, -bound, bound)
    return w, b


def build_idec_params(key, n_enc_1, n_enc_2, n_enc_3,
                      n_dec_1, n_dec_2, n_dec_3, n_input, n_z, n_clusters):
    dims = [
        (n_input, n_enc_1), (n_enc_1, n_enc_2), (n_enc_2, n_enc_3),
        (n_enc_3, n_z),
        (n_z, n_dec_1), (n_dec_1, n_dec_2), (n_dec_2, n_dec_3),
        (n_dec_3, n_input),
    ]
    keys = jax.random.split(key, len(dims) + 1)
    lin_params = [init_linear(k, i, o) for k, (i, o) in zip(keys[:-1], dims)]
    # xavier_normal_ on (n_clusters, n_z): std = sqrt(2/(fan_in+fan_out))
    std = (2.0 / (n_clusters + n_z)) ** 0.5
    clusters = std * jax.random.normal(keys[-1], (n_clusters, n_z), jnp.float32)
    return lin_params, clusters


if __name__ == "__main__":
    # small, self-consistent sizes
    n_input, n_z, n_clusters = 64, 16, 8
    n_enc_1, n_enc_2, n_enc_3 = 32, 64, 32
    n_dec_1, n_dec_2, n_dec_3 = 32, 64, 32

    key = jax.random.PRNGKey(0)
    kx1, kx2, kp = jax.random.split(key, 3)

    lin_params, clusters = build_idec_params(
        kp, n_enc_1, n_enc_2, n_enc_3, n_dec_1, n_dec_2, n_dec_3,
        n_input, n_z, n_clusters)

    # B=8: single grid step.  B=40: balanced 2-step grid (exercises padding).
    for B, kk in ((8, kx1), (40, kx2)):
        x = jax.random.normal(kk, (B, n_input), jnp.float32)

        x_bar, q = idec_forward(x, lin_params, clusters, alpha=1.0)
        jax.block_until_ready((x_bar, q))

        assert x_bar.shape == (B, n_input)
        assert q.shape == (B, n_clusters)
        assert bool(jnp.all(jnp.isfinite(x_bar))) and bool(jnp.all(jnp.isfinite(q)))
        # exact row normalization -> rows sum to 1
        assert bool(jnp.allclose(jnp.sum(q, axis=1), 1.0, atol=1e-5))

        # check against a same-precision pure-JAX reference
        xr, qr = idec_reference(x, lin_params, clusters, alpha=1.0)
        assert bool(jnp.allclose(x_bar, xr, atol=1e-2, rtol=1e-2))
        assert bool(jnp.allclose(q, qr, atol=1e-2, rtol=1e-2))

    print("KERNEL_OK")
</pallas_src>

<mosaic_0001>
module attributes {stable_mosaic.version = 11 : i64} {
  func.func @idec_kernel(%arg0: i32, %arg1: memref<16x128xbf16, #tpu.memory_space<vmem>>, %arg2: memref<128x128xbf16, #tpu.memory_space<vmem>>, %arg3: memref<128x128xbf16, #tpu.memory_space<vmem>>, %arg4: memref<128x128xbf16, #tpu.memory_space<vmem>>, %arg5: memref<128x128xbf16, #tpu.memory_space<vmem>>, %arg6: memref<128x128xbf16, #tpu.memory_space<vmem>>, %arg7: memref<128x128xbf16, #tpu.memory_space<vmem>>, %arg8: memref<128x128xbf16, #tpu.memory_space<vmem>>, %arg9: memref<128x128xbf16, #tpu.memory_space<vmem>>, %arg10: memref<8x128xf32, #tpu.memory_space<vmem>>, %arg11: memref<128x128xf32, #tpu.memory_space<vmem>>, %arg12: memref<1x128xf32, #tpu.memory_space<vmem>>, %arg13: memref<16x128xf32, #tpu.memory_space<vmem>>, %arg14: memref<16x128xf32, #tpu.memory_space<vmem>>) attributes {dimension_semantics = [#tpu.dimension_semantics<parallel>], iteration_bounds = array<i64: 1>, scalar_prefetch = 0 : i64, scratch_operands = 0 : i64, tpu.core_type = #tpu.core_type<tc>, window_params = [{transform_indices = @transform_0, window_bounds = array<i64: 16, 128>}, {pipeline_mode = #tpu.pipeline_mode<synchronous>, transform_indices = @transform_1, window_bounds = array<i64: 128, 128>}, {pipeline_mode = #tpu.pipeline_mode<synchronous>, transform_indices = @transform_2, window_bounds = array<i64: 128, 128>}, {pipeline_mode = #tpu.pipeline_mode<synchronous>, transform_indices = @transform_3, window_bounds = array<i64: 128, 128>}, {pipeline_mode = #tpu.pipeline_mode<synchronous>, transform_indices = @transform_4, window_bounds = array<i64: 128, 128>}, {pipeline_mode = #tpu.pipeline_mode<synchronous>, transform_indices = @transform_5, window_bounds = array<i64: 128, 128>}, {pipeline_mode = #tpu.pipeline_mode<synchronous>, transform_indices = @transform_6, window_bounds = array<i64: 128, 128>}, {pipeline_mode = #tpu.pipeline_mode<synchronous>, transform_indices = @transform_7, window_bounds = array<i64: 128, 128>}, {pipeline_mode = #tpu.pipeline_mode<synchronous>, transform_indices = @transform_8, window_bounds = array<i64: 128, 128>}, {pipeline_mode = #tpu.pipeline_mode<synchronous>, transform_indices = @transform_9, window_bounds = array<i64: 8, 128>}, {pipeline_mode = #tpu.pipeline_mode<synchronous>, transform_indices = @transform_10, window_bounds = array<i64: 128, 128>}, {pipeline_mode = #tpu.pipeline_mode<synchronous>, transform_indices = @transform_11, window_bounds = array<i64: 1, 128>}, {transform_indices = @transform_12, window_bounds = array<i64: 16, 128>}, {transform_indices = @transform_13, window_bounds = array<i64: 16, 128>}]} {
    %c0 = arith.constant 0 : index
    %c0_0 = arith.constant 0 : index
    %0 = vector.load %arg1[%c0, %c0_0] : memref<16x128xbf16, #tpu.memory_space<vmem>>, vector<16x128xbf16>
    %c0_1 = arith.constant 0 : index
    %c0_2 = arith.constant 0 : index
    %1 = vector.load %arg2[%c0_1, %c0_2] : memref<128x128xbf16, #tpu.memory_space<vmem>>, vector<128x128xbf16>
    %cst = arith.constant dense<0.000000e+00> : vector<16x128xf32>
    %2 = tpu.matmul %0, %1, %cst {dimension_numbers = #tpu.dot_dimension_numbers<[1], [0], [0], [1], [0, 0, 1, 1], [], []>} : vector<16x128xbf16>, vector<128x128xbf16>, vector<16x128xf32> -> vector<16x128xf32>
    %c0_3 = arith.constant 0 : index
    %c0_4 = arith.constant 0 : index
    %3 = vector.load %arg10[%c0_3, %c0_4] : memref<8x128xf32, #tpu.memory_space<vmem>>, vector<1x128xf32>
    %4 = vector.broadcast %3 : vector<1x128xf32> to vector<16x128xf32>
    %5 = arith.addf %2, %4 : vector<16x128xf32>
    %cst_5 = arith.constant 0.000000e+00 : f32
    %6 = vector.broadcast %cst_5 : f32 to vector<16x128xf32>
    %7 = arith.maximumf %5, %6 : vector<16x128xf32>
    %8 = arith.truncf %7 : vector<16x128xf32> to vector<16x128xbf16>
    %c0_6 = arith.constant 0 : index
    %c0_7 = arith.constant 0 : index
    %9 = vector.load %arg3[%c0_6, %c0_7] : memref<128x128xbf16, #tpu.memory_space<vmem>>, vector<128x128xbf16>
    %cst_8 = arith.constant dense<0.000000e+00> : vector<16x128xf32>
    %10 = tpu.matmul %8, %9, %cst_8 {dimension_numbers = #tpu.dot_dimension_numbers<[1], [0], [0], [1], [0, 0, 1, 1], [], []>} : vector<16x128xbf16>, vector<128x128xbf16>, vector<16x128xf32> -> vector<16x128xf32>
    %c1 = arith.constant 1 : index
    %c0_9 = arith.constant 0 : index
    %11 = vector.load %arg10[%c1, %c0_9] : memref<8x128xf32, #tpu.memory_space<vmem>>, vector<1x128xf32>
    %12 = vector.broadcast %11 : vector<1x128xf32> to vector<16x128xf32>
    %13 = arith.addf %10, %12 : vector<16x128xf32>
    %cst_10 = arith.constant 0.000000e+00 : f32
    %14 = vector.broadcast %cst_10 : f32 to vector<16x128xf32>
    %15 = arith.maximumf %13, %14 : vector<16x128xf32>
    %16 = arith.truncf %15 : vector<16x128xf32> to vector<16x128xbf16>
    %c0_11 = arith.constant 0 : index
    %c0_12 = arith.constant 0 : index
    %17 = vector.load %arg4[%c0_11, %c0_12] : memref<128x128xbf16, #tpu.memory_space<vmem>>, vector<128x128xbf16>
    %cst_13 = arith.constant dense<0.000000e+00> : vector<16x128xf32>
    %18 = tpu.matmul %16, %17, %cst_13 {dimension_numbers = #tpu.dot_dimension_numbers<[1], [0], [0], [1], [0, 0, 1, 1], [], []>} : vector<16x128xbf16>, vector<128x128xbf16>, vector<16x128xf32> -> vector<16x128xf32>
    %c2 = arith.constant 2 : index
    %c0_14 = arith.constant 0 : index
    %19 = vector.load %arg10[%c2, %c0_14] : memref<8x128xf32, #tpu.memory_space<vmem>>, vector<1x128xf32>
    %20 = vector.broadcast %19 : vector<1x128xf32> to vector<16x128xf32>
    %21 = arith.addf %18, %20 : vector<16x128xf32>
    %cst_15 = arith.constant 0.000000e+00 : f32
    %22 = vector.broadcast %cst_15 : f32 to vector<16x128xf32>
    %23 = arith.maximumf %21, %22 : vector<16x128xf32>
    %24 = arith.truncf %23 : vector<16x128xf32> to vector<16x128xbf16>
    %c0_16 = arith.constant 0 : index
    %c0_17 = arith.constant 0 : index
    %25 = vector.load %arg5[%c0_16, %c0_17] : memref<128x128xbf16, #tpu.memory_space<vmem>>, vector<128x128xbf16>
    %cst_18 = arith.constant dense<0.000000e+00> : vector<16x128xf32>
    %26 = tpu.matmul %24, %25, %cst_18 {dimension_numbers = #tpu.dot_dimension_numbers<[1], [0], [0], [1], [0, 0, 1, 1], [], []>} : vector<16x128xbf16>, vector<128x128xbf16>, vector<16x128xf32> -> vector<16x128xf32>
    %c3 = arith.constant 3 : index
    %c0_19 = arith.constant 0 : index
    %27 = vector.load %arg10[%c3, %c0_19] : memref<8x128xf32, #tpu.memory_space<vmem>>, vector<1x128xf32>
    %28 = vector.broadcast %27 : vector<1x128xf32> to vector<16x128xf32>
    %29 = arith.addf %26, %28 : vector<16x128xf32>
    %30 = arith.truncf %29 : vector<16x128xf32> to vector<16x128xbf16>
    %c0_20 = arith.constant 0 : index
    %c0_21 = arith.constant 0 : index
    %31 = vector.load %arg6[%c0_20, %c0_21] : memref<128x128xbf16, #tpu.memory_space<vmem>>, vector<128x128xbf16>
    %cst_22 = arith.constant dense<0.000000e+00> : vector<16x128xf32>
    %32 = tpu.matmul %30, %31, %cst_22 {dimension_numbers = #tpu.dot_dimension_numbers<[1], [0], [0], [1], [0, 0, 1, 1], [], []>} : vector<16x128xbf16>, vector<128x128xbf16>, vector<16x128xf32> -> vector<16x128xf32>
    %c4 = arith.constant 4 : index
    %c0_23 = arith.constant 0 : index
    %33 = vector.load %arg10[%c4, %c0_23] : memref<8x128xf32, #tpu.memory_space<vmem>>, vector<1x128xf32>
    %34 = vector.broadcast %33 : vector<1x128xf32> to vector<16x128xf32>
    %35 = arith.addf %32, %34 : vector<16x128xf32>
    %cst_24 = arith.constant 0.000000e+00 : f32
    %36 = vector.broadcast %cst_24 : f32 to vector<16x128xf32>
    %37 = arith.maximumf %35, %36 : vector<16x128xf32>
    %38 = arith.truncf %37 : vector<16x128xf32> to vector<16x128xbf16>
    %c0_25 = arith.constant 0 : index
    %c0_26 = arith.constant 0 : index
    %39 = vector.load %arg7[%c0_25, %c0_26] : memref<128x128xbf16, #tpu.memory_space<vmem>>, vector<128x128xbf16>
    %cst_27 = arith.constant dense<0.000000e+00> : vector<16x128xf32>
    %40 = tpu.matmul %38, %39, %cst_27 {dimension_numbers = #tpu.dot_dimension_numbers<[1], [0], [0], [1], [0, 0, 1, 1], [], []>} : vector<16x128xbf16>, vector<128x128xbf16>, vector<16x128xf32> -> vector<16x128xf32>
    %c5 = arith.constant 5 : index
    %c0_28 = arith.constant 0 : index
    %41 = vector.load %arg10[%c5, %c0_28] : memref<8x128xf32, #tpu.memory_space<vmem>>, vector<1x128xf32>
    %42 = vector.broadcast %41 : vector<1x128xf32> to vector<16x128xf32>
    %43 = arith.addf %40, %42 : vector<16x128xf32>
    %cst_29 = arith.constant 0.000000e+00 : f32
    %44 = vector.broadcast %cst_29 : f32 to vector<16x128xf32>
    %45 = arith.maximumf %43, %44 : vector<16x128xf32>
    %46 = arith.truncf %45 : vector<16x128xf32> to vector<16x128xbf16>
    %c0_30 = arith.constant 0 : index
    %c0_31 = arith.constant 0 : index
    %47 = vector.load %arg8[%c0_30, %c0_31] : memref<128x128xbf16, #tpu.memory_space<vmem>>, vector<128x128xbf16>
    %cst_32 = arith.constant dense<0.000000e+00> : vector<16x128xf32>
    %48 = tpu.matmul %46, %47, %cst_32 {dimension_numbers = #tpu.dot_dimension_numbers<[1], [0], [0], [1], [0, 0, 1, 1], [], []>} : vector<16x128xbf16>, vector<128x128xbf16>, vector<16x128xf32> -> vector<16x128xf32>
    %c6 = arith.constant 6 : index
    %c0_33 = arith.constant 0 : index
    %49 = vector.load %arg10[%c6, %c0_33] : memref<8x128xf32, #tpu.memory_space<vmem>>, vector<1x128xf32>
    %50 = vector.broadcast %49 : vector<1x128xf32> to vector<16x128xf32>
    %51 = arith.addf %48, %50 : vector<16x128xf32>
    %cst_34 = arith.constant 0.000000e+00 : f32
    %52 = vector.broadcast %cst_34 : f32 to vector<16x128xf32>
    %53 = arith.maximumf %51, %52 : vector<16x128xf32>
    %54 = arith.truncf %53 : vector<16x128xf32> to vector<16x128xbf16>
    %c0_35 = arith.constant 0 : index
    %c0_36 = arith.constant 0 : index
    %55 = vector.load %arg9[%c0_35, %c0_36] : memref<128x128xbf16, #tpu.memory_space<vmem>>, vector<128x128xbf16>
    %cst_37 = arith.constant dense<0.000000e+00> : vector<16x128xf32>
    %56 = tpu.matmul %54, %55, %cst_37 {dimension_numbers = #tpu.dot_dimension_numbers<[1], [0], [0], [1], [0, 0, 1, 1], [], []>} : vector<16x128xbf16>, vector<128x128xbf16>, vector<16x128xf32> -> vector<16x128xf32>
    %c7 = arith.constant 7 : index
    %c0_38 = arith.constant 0 : index
    %57 = vector.load %arg10[%c7, %c0_38] : memref<8x128xf32, #tpu.memory_space<vmem>>, vector<1x128xf32>
    %58 = vector.broadcast %57 : vector<1x128xf32> to vector<16x128xf32>
    %59 = arith.addf %56, %58 : vector<16x128xf32>
    %c0_39 = arith.constant 0 : index
    %c0_40 = arith.constant 0 : index
    %60 = vector.load %arg13[%c0_39, %c0_40] : memref<16x128xf32, #tpu.memory_space<vmem>>, vector<16x128xf32>
    tpu.vector_store %arg13[%c0_39, %c0_40], %59 {strides = array<i32>} : memref<16x128xf32, #tpu.memory_space<vmem>>, vector<16x128xf32>,
    %c0_41 = arith.constant 0 : index
    %c0_42 = arith.constant 0 : index
    %61 = vector.load %arg11[%c0_41, %c0_42] : memref<128x128xf32, #tpu.memory_space<vmem>>, vector<128x128xf32>
    %62 = arith.mulf %29, %29 : vector<16x128xf32>
    %cst_43 = arith.constant dense<0.000000e+00> : vector<16xf32>
    %63 = vector.multi_reduction <add>, %62, %cst_43 [1] : vector<16x128xf32> to vector<16xf32>
    %64 = vector.shape_cast %63 : vector<16xf32> to vector<16x1xf32>
    %cst_44 = arith.constant dense<0.000000e+00> : vector<16x128xf32>
    %65 = tpu.matmul %29, %61, %cst_44 {dimension_numbers = #tpu.dot_dimension_numbers<[1], [0], [0], [1], [0, 0, 1, 1], [], []>} : vector<16x128xf32>, vector<128x128xf32>, vector<16x128xf32> -> vector<16x128xf32>
    %c0_45 = arith.constant 0 : index
    %c0_46 = arith.constant 0 : index
    %66 = vector.load %arg12[%c0_45, %c0_46] : memref<1x128xf32, #tpu.memory_space<vmem>>, vector<1x128xf32>
    %67 = vector.broadcast %64 : vector<16x1xf32> to vector<16x128xf32>
    %68 = vector.broadcast %66 : vector<1x128xf32> to vector<16x128xf32>
    %69 = arith.addf %67, %68 : vector<16x128xf32>
    %cst_47 = arith.constant 2.000000e+00 : f32
    %70 = vector.broadcast %cst_47 : f32 to vector<16x128xf32>
    %71 = arith.mulf %70, %65 : vector<16x128xf32>
    %72 = arith.subf %69, %71 : vector<16x128xf32>
    %cst_48 = arith.constant 0.000000e+00 : f32
    %73 = vector.broadcast %cst_48 : f32 to vector<16x128xf32>
    %74 = arith.maximumf %72, %73 : vector<16x128xf32>
    %cst_49 = arith.constant 1.000000e+00 : f32
    %75 = vector.broadcast %cst_49 : f32 to vector<16x128xf32>
    %76 = arith.mulf %74, %75 : vector<16x128xf32>
    %cst_50 = arith.constant 1.000000e+00 : f32
    %77 = vector.broadcast %cst_50 : f32 to vector<16x128xf32>
    %78 = arith.addf %77, %76 : vector<16x128xf32>
    %79 = tpu.reciprocal %78 {approx = true} : vector<16x128xf32> -> vector<16x128xf32>
    %80 = tpu.iota {dimensions = array<i32: 1>} : vector<16x128xi32>
    %c8_i32 = arith.constant 8 : i32
    %81 = vector.broadcast %c8_i32 : i32 to vector<16x128xi32>
    %82 = arith.cmpi slt, %80, %81 : vector<16x128xi32>
    %cst_51 = arith.constant 0.000000e+00 : f32
    %83 = vector.broadcast %cst_51 : f32 to vector<16x128xf32>
    %84 = arith.select %82, %79, %83 : vector<16x128xi1>, vector<16x128xf32>
    %cst_52 = arith.constant dense<0.000000e+00> : vector<16xf32>
    %85 = vector.multi_reduction <add>, %84, %cst_52 [1] : vector<16x128xf32> to vector<16xf32>
    %86 = vector.shape_cast %85 : vector<16xf32> to vector<16x1xf32>
    %87 = vector.broadcast %86 : vector<16x1xf32> to vector<16x128xf32>
    %88 = arith.divf %84, %87 : vector<16x128xf32>
    %c0_53 = arith.constant 0 : index
    %c0_54 = arith.constant 0 : index
    %89 = vector.load %arg14[%c0_53, %c0_54] : memref<16x128xf32, #tpu.memory_space<vmem>>, vector<16x128xf32>
    tpu.vector_store %arg14[%c0_53, %c0_54], %88 {strides = array<i32>} : memref<16x128xf32, #tpu.memory_space<vmem>>, vector<16x128xf32>,
    return
  }
  func.func @transform_0(%arg0: i32) -> (i32, i32) {
    %c0_i32 = arith.constant 0 : i32
    %c0_i32_0 = arith.constant 0 : i32
    return %arg0, %c0_i32 : i32, i32
  }
  func.func @transform_1(%arg0: i32) -> (i32, i32) {
    %c0_i32 = arith.constant 0 : i32
    %c0_i32_0 = arith.constant 0 : i32
    %c0_i32_1 = arith.constant 0 : i32
    return %c0_i32, %c0_i32_0 : i32, i32
  }
  func.func @transform_2(%arg0: i32) -> (i32, i32) {
    %c0_i32 = arith.constant 0 : i32
    %c0_i32_0 = arith.constant 0 : i32
    %c0_i32_1 = arith.constant 0 : i32
    return %c0_i32, %c0_i32_0 : i32, i32
  }
  func.func @transform_3(%arg0: i32) -> (i32, i32) {
    %c0_i32 = arith.constant 0 : i32
    %c0_i32_0 = arith.constant 0 : i32
    %c0_i32_1 = arith.constant 0 : i32
    return %c0_i32, %c0_i32_0 : i32, i32
  }
  func.func @transform_4(%arg0: i32) -> (i32, i32) {
    %c0_i32 = arith.constant 0 : i32
    %c0_i32_0 = arith.constant 0 : i32
    %c0_i32_1 = arith.constant 0 : i32
    return %c0_i32, %c0_i32_0 : i32, i32
  }
  func.func @transform_5(%arg0: i32) -> (i32, i32) {
    %c0_i32 = arith.constant 0 : i32
    %c0_i32_0 = arith.constant 0 : i32
    %c0_i32_1 = arith.constant 0 : i32
    return %c0_i32, %c0_i32_0 : i32, i32
  }
  func.func @transform_6(%arg0: i32) -> (i32, i32) {
    %c0_i32 = arith.constant 0 : i32
    %c0_i32_0 = arith.constant 0 : i32
    %c0_i32_1 = arith.constant 0 : i32
    return %c0_i32, %c0_i32_0 : i32, i32
  }
  func.func @transform_7(%arg0: i32) -> (i32, i32) {
    %c0_i32 = arith.constant 0 : i32
    %c0_i32_0 = arith.constant 0 : i32
    %c0_i32_1 = arith.constant 0 : i32
    return %c0_i32, %c0_i32_0 : i32, i32
  }
  func.func @transform_8(%arg0: i32) -> (i32, i32) {
    %c0_i32 = arith.constant 0 : i32
    %c0_i32_0 = arith.constant 0 : i32
    %c0_i32_1 = arith.constant 0 : i32
    return %c0_i32, %c0_i32_0 : i32, i32
  }
  func.func @transform_9(%arg0: i32) -> (i32, i32) {
    %c0_i32 = arith.constant 0 : i32
    %c0_i32_0 = arith.constant 0 : i32
    %c0_i32_1 = arith.constant 0 : i32
    return %c0_i32, %c0_i32_0 : i32, i32
  }
  func.func @transform_10(%arg0: i32) -> (i32, i32) {
    %c0_i32 = arith.constant 0 : i32
    %c0_i32_0 = arith.constant 0 : i32
    %c0_i32_1 = arith.constant 0 : i32
    return %c0_i32, %c0_i32_0 : i32, i32
  }
  func.func @transform_11(%arg0: i32) -> (i32, i32) {
    %c0_i32 = arith.constant 0 : i32
    %c0_i32_0 = arith.constant 0 : i32
    %c0_i32_1 = arith.constant 0 : i32
    return %c0_i32, %c0_i32_0 : i32, i32
  }
  func.func @transform_12(%arg0: i32) -> (i32, i32) {
    %c0_i32 = arith.constant 0 : i32
    %c0_i32_0 = arith.constant 0 : i32
    return %arg0, %c0_i32 : i32, i32
  }
  func.func @transform_13(%arg0: i32) -> (i32, i32) {
    %c0_i32 = arith.constant 0 : i32
    %c0_i32_0 = arith.constant 0 : i32
    return %arg0, %c0_i32 : i32, i32
  }
}

module attributes {stable_mosaic.version = 11 : i64} {
  func.func @idec_kernel(%arg0: i32, %arg1: memref<16x128xbf16, #tpu.memory_space<vmem>>, %arg2: memref<128x128xbf16, #tpu.memory_space<vmem>>, %arg3: memref<128x128xbf16, #tpu.memory_space<vmem>>, %arg4: memref<128x128xbf16, #tpu.memory_space<vmem>>, %arg5: memref<128x128xbf16, #tpu.memory_space<vmem>>, %arg6: memref<128x128xbf16, #tpu.memory_space<vmem>>, %arg7: memref<128x128xbf16, #tpu.memory_space<vmem>>, %arg8: memref<128x128xbf16, #tpu.memory_space<vmem>>, %arg9: memref<128x128xbf16, #tpu.memory_space<vmem>>, %arg10: memref<8x128xf32, #tpu.memory_space<vmem>>, %arg11: memref<128x128xf32, #tpu.memory_space<vmem>>, %arg12: memref<1x128xf32, #tpu.memory_space<vmem>>, %arg13: memref<16x128xf32, #tpu.memory_space<vmem>>, %arg14: memref<16x128xf32, #tpu.memory_space<vmem>>) attributes {dimension_semantics = [#tpu.dimension_semantics<parallel>], iteration_bounds = array<i64: 1>, scalar_prefetch = 0 : i64, scratch_operands = 0 : i64, tpu.core_type = #tpu.core_type<tc>, window_params = [{transform_indices = @transform_0, window_bounds = array<i64: 16, 128>}, {pipeline_mode = #tpu.pipeline_mode<synchronous>, transform_indices = @transform_1, window_bounds = array<i64: 128, 128>}, {pipeline_mode = #tpu.pipeline_mode<synchronous>, transform_indices = @transform_2, window_bounds = array<i64: 128, 128>}, {pipeline_mode = #tpu.pipeline_mode<synchronous>, transform_indices = @transform_3, window_bounds = array<i64: 128, 128>}, {pipeline_mode = #tpu.pipeline_mode<synchronous>, transform_indices = @transform_4, window_bounds = array<i64: 128, 128>}, {pipeline_mode = #tpu.pipeline_mode<synchronous>, transform_indices = @transform_5, window_bounds = array<i64: 128, 128>}, {pipeline_mode = #tpu.pipeline_mode<synchronous>, transform_indices = @transform_6, window_bounds = array<i64: 128, 128>}, {pipeline_mode = #tpu.pipeline_mode<synchronous>, transform_indices = @transform_7, window_bounds = array<i64: 128, 128>}, {pipeline_mode = #tpu.pipeline_mode<synchronous>, transform_indices = @transform_8, window_bounds = array<i64: 128, 128>}, {pipeline_mode = #tpu.pipeline_mode<synchronous>, transform_indices = @transform_9, window_bounds = array<i64: 8, 128>}, {pipeline_mode = #tpu.pipeline_mode<synchronous>, transform_indices = @transform_10, window_bounds = array<i64: 128, 128>}, {pipeline_mode = #tpu.pipeline_mode<synchronous>, transform_indices = @transform_11, window_bounds = array<i64: 1, 128>}, {transform_indices = @transform_12, window_bounds = array<i64: 16, 128>}, {transform_indices = @transform_13, window_bounds = array<i64: 16, 128>}]} {
    %c0 = arith.constant 0 : index
    %c0_0 = arith.constant 0 : index
    %0 = vector.load %arg1[%c0, %c0_0] : memref<16x128xbf16, #tpu.memory_space<vmem>>, vector<16x128xbf16>
    %c0_1 = arith.constant 0 : index
    %c0_2 = arith.constant 0 : index
    %1 = vector.load %arg2[%c0_1, %c0_2] : memref<128x128xbf16, #tpu.memory_space<vmem>>, vector<128x128xbf16>
    %cst = arith.constant dense<0.000000e+00> : vector<16x128xf32>
    %2 = tpu.matmul %0, %1, %cst {dimension_numbers = #tpu.dot_dimension_numbers<[1], [0], [0], [1], [0, 0, 1, 1], [], []>} : vector<16x128xbf16>, vector<128x128xbf16>, vector<16x128xf32> -> vector<16x128xf32>
    %c0_3 = arith.constant 0 : index
    %c0_4 = arith.constant 0 : index
    %3 = vector.load %arg10[%c0_3, %c0_4] : memref<8x128xf32, #tpu.memory_space<vmem>>, vector<1x128xf32>
    %4 = vector.broadcast %3 : vector<1x128xf32> to vector<16x128xf32>
    %5 = arith.addf %2, %4 : vector<16x128xf32>
    %cst_5 = arith.constant 0.000000e+00 : f32
    %6 = vector.broadcast %cst_5 : f32 to vector<16x128xf32>
    %7 = arith.maximumf %5, %6 : vector<16x128xf32>
    %8 = arith.truncf %7 : vector<16x128xf32> to vector<16x128xbf16>
    %c0_6 = arith.constant 0 : index
    %c0_7 = arith.constant 0 : index
    %9 = vector.load %arg3[%c0_6, %c0_7] : memref<128x128xbf16, #tpu.memory_space<vmem>>, vector<128x128xbf16>
    %cst_8 = arith.constant dense<0.000000e+00> : vector<16x128xf32>
    %10 = tpu.matmul %8, %9, %cst_8 {dimension_numbers = #tpu.dot_dimension_numbers<[1], [0], [0], [1], [0, 0, 1, 1], [], []>} : vector<16x128xbf16>, vector<128x128xbf16>, vector<16x128xf32> -> vector<16x128xf32>
    %c1 = arith.constant 1 : index
    %c0_9 = arith.constant 0 : index
    %11 = vector.load %arg10[%c1, %c0_9] : memref<8x128xf32, #tpu.memory_space<vmem>>, vector<1x128xf32>
    %12 = vector.broadcast %11 : vector<1x128xf32> to vector<16x128xf32>
    %13 = arith.addf %10, %12 : vector<16x128xf32>
    %cst_10 = arith.constant 0.000000e+00 : f32
    %14 = vector.broadcast %cst_10 : f32 to vector<16x128xf32>
    %15 = arith.maximumf %13, %14 : vector<16x128xf32>
    %16 = arith.truncf %15 : vector<16x128xf32> to vector<16x128xbf16>
    %c0_11 = arith.constant 0 : index
    %c0_12 = arith.constant 0 : index
    %17 = vector.load %arg4[%c0_11, %c0_12] : memref<128x128xbf16, #tpu.memory_space<vmem>>, vector<128x128xbf16>
    %cst_13 = arith.constant dense<0.000000e+00> : vector<16x128xf32>
    %18 = tpu.matmul %16, %17, %cst_13 {dimension_numbers = #tpu.dot_dimension_numbers<[1], [0], [0], [1], [0, 0, 1, 1], [], []>} : vector<16x128xbf16>, vector<128x128xbf16>, vector<16x128xf32> -> vector<16x128xf32>
    %c2 = arith.constant 2 : index
    %c0_14 = arith.constant 0 : index
    %19 = vector.load %arg10[%c2, %c0_14] : memref<8x128xf32, #tpu.memory_space<vmem>>, vector<1x128xf32>
    %20 = vector.broadcast %19 : vector<1x128xf32> to vector<16x128xf32>
    %21 = arith.addf %18, %20 : vector<16x128xf32>
    %cst_15 = arith.constant 0.000000e+00 : f32
    %22 = vector.broadcast %cst_15 : f32 to vector<16x128xf32>
    %23 = arith.maximumf %21, %22 : vector<16x128xf32>
    %24 = arith.truncf %23 : vector<16x128xf32> to vector<16x128xbf16>
    %c0_16 = arith.constant 0 : index
    %c0_17 = arith.constant 0 : index
    %25 = vector.load %arg5[%c0_16, %c0_17] : memref<128x128xbf16, #tpu.memory_space<vmem>>, vector<128x128xbf16>
    %cst_18 = arith.constant dense<0.000000e+00> : vector<16x128xf32>
    %26 = tpu.matmul %24, %25, %cst_18 {dimension_numbers = #tpu.dot_dimension_numbers<[1], [0], [0], [1], [0, 0, 1, 1], [], []>} : vector<16x128xbf16>, vector<128x128xbf16>, vector<16x128xf32> -> vector<16x128xf32>
    %c3 = arith.constant 3 : index
    %c0_19 = arith.constant 0 : index
    %27 = vector.load %arg10[%c3, %c0_19] : memref<8x128xf32, #tpu.memory_space<vmem>>, vector<1x128xf32>
    %28 = vector.broadcast %27 : vector<1x128xf32> to vector<16x128xf32>
    %29 = arith.addf %26, %28 : vector<16x128xf32>
    %30 = arith.truncf %29 : vector<16x128xf32> to vector<16x128xbf16>
    %c0_20 = arith.constant 0 : index
    %c0_21 = arith.constant 0 : index
    %31 = vector.load %arg6[%c0_20, %c0_21] : memref<128x128xbf16, #tpu.memory_space<vmem>>, vector<128x128xbf16>
    %cst_22 = arith.constant dense<0.000000e+00> : vector<16x128xf32>
    %32 = tpu.matmul %30, %31, %cst_22 {dimension_numbers = #tpu.dot_dimension_numbers<[1], [0], [0], [1], [0, 0, 1, 1], [], []>} : vector<16x128xbf16>, vector<128x128xbf16>, vector<16x128xf32> -> vector<16x128xf32>
    %c4 = arith.constant 4 : index
    %c0_23 = arith.constant 0 : index
    %33 = vector.load %arg10[%c4, %c0_23] : memref<8x128xf32, #tpu.memory_space<vmem>>, vector<1x128xf32>
    %34 = vector.broadcast %33 : vector<1x128xf32> to vector<16x128xf32>
    %35 = arith.addf %32, %34 : vector<16x128xf32>
    %cst_24 = arith.constant 0.000000e+00 : f32
    %36 = vector.broadcast %cst_24 : f32 to vector<16x128xf32>
    %37 = arith.maximumf %35, %36 : vector<16x128xf32>
    %38 = arith.truncf %37 : vector<16x128xf32> to vector<16x128xbf16>
    %c0_25 = arith.constant 0 : index
    %c0_26 = arith.constant 0 : index
    %39 = vector.load %arg7[%c0_25, %c0_26] : memref<128x128xbf16, #tpu.memory_space<vmem>>, vector<128x128xbf16>
    %cst_27 = arith.constant dense<0.000000e+00> : vector<16x128xf32>
    %40 = tpu.matmul %38, %39, %cst_27 {dimension_numbers = #tpu.dot_dimension_numbers<[1], [0], [0], [1], [0, 0, 1, 1], [], []>} : vector<16x128xbf16>, vector<128x128xbf16>, vector<16x128xf32> -> vector<16x128xf32>
    %c5 = arith.constant 5 : index
    %c0_28 = arith.constant 0 : index
    %41 = vector.load %arg10[%c5, %c0_28] : memref<8x128xf32, #tpu.memory_space<vmem>>, vector<1x128xf32>
    %42 = vector.broadcast %41 : vector<1x128xf32> to vector<16x128xf32>
    %43 = arith.addf %40, %42 : vector<16x128xf32>
    %cst_29 = arith.constant 0.000000e+00 : f32
    %44 = vector.broadcast %cst_29 : f32 to vector<16x128xf32>
    %45 = arith.maximumf %43, %44 : vector<16x128xf32>
    %46 = arith.truncf %45 : vector<16x128xf32> to vector<16x128xbf16>
    %c0_30 = arith.constant 0 : index
    %c0_31 = arith.constant 0 : index
    %47 = vector.load %arg8[%c0_30, %c0_31] : memref<128x128xbf16, #tpu.memory_space<vmem>>, vector<128x128xbf16>
    %cst_32 = arith.constant dense<0.000000e+00> : vector<16x128xf32>
    %48 = tpu.matmul %46, %47, %cst_32 {dimension_numbers = #tpu.dot_dimension_numbers<[1], [0], [0], [1], [0, 0, 1, 1], [], []>} : vector<16x128xbf16>, vector<128x128xbf16>, vector<16x128xf32> -> vector<16x128xf32>
    %c6 = arith.constant 6 : index
    %c0_33 = arith.constant 0 : index
    %49 = vector.load %arg10[%c6, %c0_33] : memref<8x128xf32, #tpu.memory_space<vmem>>, vector<1x128xf32>
    %50 = vector.broadcast %49 : vector<1x128xf32> to vector<16x128xf32>
    %51 = arith.addf %48, %50 : vector<16x128xf32>
    %cst_34 = arith.constant 0.000000e+00 : f32
    %52 = vector.broadcast %cst_34 : f32 to vector<16x128xf32>
    %53 = arith.maximumf %51, %52 : vector<16x128xf32>
    %54 = arith.truncf %53 : vector<16x128xf32> to vector<16x128xbf16>
    %c0_35 = arith.constant 0 : index
    %c0_36 = arith.constant 0 : index
    %55 = vector.load %arg9[%c0_35, %c0_36] : memref<128x128xbf16, #tpu.memory_space<vmem>>, vector<128x128xbf16>
    %cst_37 = arith.constant dense<0.000000e+00> : vector<16x128xf32>
    %56 = tpu.matmul %54, %55, %cst_37 {dimension_numbers = #tpu.dot_dimension_numbers<[1], [0], [0], [1], [0, 0, 1, 1], [], []>} : vector<16x128xbf16>, vector<128x128xbf16>, vector<16x128xf32> -> vector<16x128xf32>
    %c7 = arith.constant 7 : index
    %c0_38 = arith.constant 0 : index
    %57 = vector.load %arg10[%c7, %c0_38] : memref<8x128xf32, #tpu.memory_space<vmem>>, vector<1x128xf32>
    %58 = vector.broadcast %57 : vector<1x128xf32> to vector<16x128xf32>
    %59 = arith.addf %56, %58 : vector<16x128xf32>
    %c0_39 = arith.constant 0 : index
    %c0_40 = arith.constant 0 : index
    %60 = vector.load %arg13[%c0_39, %c0_40] : memref<16x128xf32, #tpu.memory_space<vmem>>, vector<16x128xf32>
    tpu.vector_store %arg13[%c0_39, %c0_40], %59 {strides = array<i32>} : memref<16x128xf32, #tpu.memory_space<vmem>>, vector<16x128xf32>,
    %c0_41 = arith.constant 0 : index
    %c0_42 = arith.constant 0 : index
    %61 = vector.load %arg11[%c0_41, %c0_42] : memref<128x128xf32, #tpu.memory_space<vmem>>, vector<128x128xf32>
    %62 = arith.mulf %29, %29 : vector<16x128xf32>
    %cst_43 = arith.constant dense<0.000000e+00> : vector<16xf32>
    %63 = vector.multi_reduction <add>, %62, %cst_43 [1] : vector<16x128xf32> to vector<16xf32>
    %64 = vector.shape_cast %63 : vector<16xf32> to vector<16x1xf32>
    %cst_44 = arith.constant dense<0.000000e+00> : vector<16x128xf32>
    %65 = tpu.matmul %29, %61, %cst_44 {dimension_numbers = #tpu.dot_dimension_numbers<[1], [0], [0], [1], [0, 0, 1, 1], [], []>} : vector<16x128xf32>, vector<128x128xf32>, vector<16x128xf32> -> vector<16x128xf32>
    %c0_45 = arith.constant 0 : index
    %c0_46 = arith.constant 0 : index
    %66 = vector.load %arg12[%c0_45, %c0_46] : memref<1x128xf32, #tpu.memory_space<vmem>>, vector<1x128xf32>
    %67 = vector.broadcast %64 : vector<16x1xf32> to vector<16x128xf32>
    %68 = vector.broadcast %66 : vector<1x128xf32> to vector<16x128xf32>
    %69 = arith.addf %67, %68 : vector<16x128xf32>
    %cst_47 = arith.constant 2.000000e+00 : f32
    %70 = vector.broadcast %cst_47 : f32 to vector<16x128xf32>
    %71 = arith.mulf %70, %65 : vector<16x128xf32>
    %72 = arith.subf %69, %71 : vector<16x128xf32>
    %cst_48 = arith.constant 0.000000e+00 : f32
    %73 = vector.broadcast %cst_48 : f32 to vector<16x128xf32>
    %74 = arith.maximumf %72, %73 : vector<16x128xf32>
    %cst_49 = arith.constant 1.000000e+00 : f32
    %75 = vector.broadcast %cst_49 : f32 to vector<16x128xf32>
    %76 = arith.mulf %74, %75 : vector<16x128xf32>
    %cst_50 = arith.constant 1.000000e+00 : f32
    %77 = vector.broadcast %cst_50 : f32 to vector<16x128xf32>
    %78 = arith.addf %77, %76 : vector<16x128xf32>
    %79 = tpu.reciprocal %78 {approx = true} : vector<16x128xf32> -> vector<16x128xf32>
    %80 = tpu.iota {dimensions = array<i32: 1>} : vector<16x128xi32>
    %c8_i32 = arith.constant 8 : i32
    %81 = vector.broadcast %c8_i32 : i32 to vector<16x128xi32>
    %82 = arith.cmpi slt, %80, %81 : vector<16x128xi32>
    %cst_51 = arith.constant 0.000000e+00 : f32
    %83 = vector.broadcast %cst_51 : f32 to vector<16x128xf32>
    %84 = arith.select %82, %79, %83 : vector<16x128xi1>, vector<16x128xf32>
    %cst_52 = arith.constant dense<0.000000e+00> : vector<16xf32>
    %85 = vector.multi_reduction <add>, %84, %cst_52 [1] : vector<16x128xf32> to vector<16xf32>
    %86 = vector.shape_cast %85 : vector<16xf32> to vector<16x1xf32>
    %87 = vector.broadcast %86 : vector<16x1xf32> to vector<16x128xf32>
    %88 = arith.divf %84, %87 : vector<16x128xf32>
    %c0_53 = arith.constant 0 : index
    %c0_54 = arith.constant 0 : index
    %89 = vector.load %arg14[%c0_53, %c0_54] : memref<16x128xf32, #tpu.memory_space<vmem>>, vector<16x128xf32>
    tpu.vector_store %arg14[%c0_53, %c0_54], %88 {strides = array<i32>} : memref<16x128xf32, #tpu.memory_space<vmem>>, vector<16x128xf32>,
    return
  }
  func.func @transform_0(%arg0: i32) -> (i32, i32) {
    %c0_i32 = arith.constant 0 : i32
    %c0_i32_0 = arith.constant 0 : i32
    return %arg0, %c0_i32 : i32, i32
  }
  func.func @transform_1(%arg0: i32) -> (i32, i32) {
    %c0_i32 = arith.constant 0 : i32
    %c0_i32_0 = arith.constant 0 : i32
    %c0_i32_1 = arith.constant 0 : i32
    return %c0_i32, %c0_i32_0 : i32, i32
  }
  func.func @transform_2(%arg0: i32) -> (i32, i32) {
    %c0_i32 = arith.constant 0 : i32
    %c0_i32_0 = arith.constant 0 : i32
    %c0_i32_1 = arith.constant 0 : i32
    return %c0_i32, %c0_i32_0 : i32, i32
  }
  func.func @transform_3(%arg0: i32) -> (i32, i32) {
    %c0_i32 = arith.constant 0 : i32
    %c0_i32_0 = arith.constant 0 : i32
    %c0_i32_1 = arith.constant 0 : i32
    return %c0_i32, %c0_i32_0 : i32, i32
  }
  func.func @transform_4(%arg0: i32) -> (i32, i32) {
    %c0_i32 = arith.constant 0 : i32
    %c0_i32_0 = arith.constant 0 : i32
    %c0_i32_1 = arith.constant 0 : i32
    return %c0_i32, %c0_i32_0 : i32, i32
  }
  func.func @transform_5(%arg0: i32) -> (i32, i32) {
    %c0_i32 = arith.constant 0 : i32
    %c0_i32_0 = arith.constant 0 : i32
    %c0_i32_1 = arith.constant 0 : i32
    return %c0_i32, %c0_i32_0 : i32, i32
  }
  func.func @transform_6(%arg0: i32) -> (i32, i32) {
    %c0_i32 = arith.constant 0 : i32
    %c0_i32_0 = arith.constant 0 : i32
    %c0_i32_1 = arith.constant 0 : i32
    return %c0_i32, %c0_i32_0 : i32, i32
  }
  func.func @transform_7(%arg0: i32) -> (i32, i32) {
    %c0_i32 = arith.constant 0 : i32
    %c0_i32_0 = arith.constant 0 : i32
    %c0_i32_1 = arith.constant 0 : i32
    return %c0_i32, %c0_i32_0 : i32, i32
  }
  func.func @transform_8(%arg0: i32) -> (i32, i32) {
    %c0_i32 = arith.constant 0 : i32
    %c0_i32_0 = arith.constant 0 : i32
    %c0_i32_1 = arith.constant 0 : i32
    return %c0_i32, %c0_i32_0 : i32, i32
  }
  func.func @transform_9(%arg0: i32) -> (i32, i32) {
    %c0_i32 = arith.constant 0 : i32
    %c0_i32_0 = arith.constant 0 : i32
    %c0_i32_1 = arith.constant 0 : i32
    return %c0_i32, %c0_i32_0 : i32, i32
  }
  func.func @transform_10(%arg0: i32) -> (i32, i32) {
    %c0_i32 = arith.constant 0 : i32
    %c0_i32_0 = arith.constant 0 : i32
    %c0_i32_1 = arith.constant 0 : i32
    return %c0_i32, %c0_i32_0 : i32, i32
  }
  func.func @transform_11(%arg0: i32) -> (i32, i32) {
    %c0_i32 = arith.constant 0 : i32
    %c0_i32_0 = arith.constant 0 : i32
    %c0_i32_1 = arith.constant 0 : i32
    return %c0_i32, %c0_i32_0 : i32, i32
  }
  func.func @transform_12(%arg0: i32) -> (i32, i32) {
    %c0_i32 = arith.constant 0 : i32
    %c0_i32_0 = arith.constant 0 : i32
    return %arg0, %c0_i32 : i32, i32
  }
  func.func @transform_13(%arg0: i32) -> (i32, i32) {
    %c0_i32 = arith.constant 0 : i32
    %c0_i32_0 = arith.constant 0 : i32
    return %arg0, %c0_i32 : i32, i32
  }
}

</mosaic_0001>

<bundles_post_ra>
// kernel: tpu_custom_call.1
= control target key start
LH: loop header
LB: loop body
LE: loop exit
PB: predicated region body
PF: predicated region fallthrough
CT: control target
= control target key end

     0   :  { %19 = vsyncpa [#allocation3], 0  ;;  %s2245_s0 = inlined_call_operand.hbm [shape: bf16[16,128], index: 0, kind: input, shape index: {}]   ;;  %s2246_s1 = inlined_call_operand.hbm [shape: bf16[128,128], index: 1, kind: input, shape index: {}]   ;;  %s2247_s2 = inlined_call_operand.hbm [shape: bf16[128,128], index: 2, kind: input, shape index: {}]   ;;  %s2248_s3 = inlined_call_operand.hbm [shape: bf16[128,128], index: 3, kind: input, shape index: {}]   ;;  %s2249_s4 = inlined_call_operand.hbm [shape: bf16[128,128], index: 4, kind: input, shape index: {}]   ;;  %s2250_s5 = inlined_call_operand.hbm [shape: bf16[128,128], index: 5, kind: input, shape index: {}]   ;;  %s2251_s6 = inlined_call_operand.hbm [shape: bf16[128,128], index: 6, kind: input, shape index: {}]   ;;  %s2252_s7 = inlined_call_operand.hbm [shape: bf16[128,128], index: 7, kind: input, shape index: {}]   ;;  %s2253_s8 = inlined_call_operand.hbm [shape: bf16[128,128], index: 8, kind: input, shape index: {}]   ;;  %s2254_s9 = inlined_call_operand.vmem [shape: f32[8,128], index: 9, kind: input, shape index: {}]   ;;  %s2255_s10 = inlined_call_operand.hbm [shape: f32[128,128], index: 10, kind: input, shape index: {}]   ;;  %s2256_s11 = inlined_call_operand.vmem [shape: f32[1,128], index: 11, kind: input, shape index: {}]   ;;  %s2257_s12 = inlined_call_operand.hbm [shape: f32[16,128], index: 12, kind: output, shape index: {0}]   ;;  %s2258_s13 = inlined_call_operand.hbm [shape: f32[16,128], index: 13, kind: output, shape index: {1}]  }
   0x1   :  { %20 = vsyncpa [#allocation6], 0 }
   0x2   :  { %21 = vsyncpa [#allocation9], 0 }
   0x3   :  { %22 = vsyncpa [#allocation12], 0 }
   0x4   :  { %23 = vsyncpa [#allocation15], 0 }
   0x5   :  { %24 = vsyncpa [#allocation18], 0 }
   0x6   :  { %25 = vsyncpa [#allocation4], 0 }
   0x7   :  { %26 = vsyncpa [#allocation21], 0  ;;  %s1966_s25 = smov [#allocation5]   ;;  %s1967_s27 = smov [#allocation8]  }
   0x8   :  { %s44_s26 = sshll.u32 %s1966_s25, 4  ;;  %s68_s28 = sshll.u32 %s1967_s27, 4  ;;  %s45_s26 = int_to_ptr.vmem [resolvable:$true] %s44_s26  ;;  %s69_s28 = int_to_ptr.vmem [resolvable:$true] %s68_s28 }
   0x9   :  { %s1718_s29 = scalar_lea.vmem %s45_s26, 1024  ;;  %p1723_p1 = scmp.lt.s32.totalorder %s45_s26, %s45_s26 }
   0xa   :  { %p1719_p0 = scmp.ne.s32.totalorder %s45_s26, %s1718_s29  ;;  %p1724_p2 = scmp.lt.s32.totalorder %s1718_s29, %s1718_s29 }
   0xc   :  { %p1725_p3 = por %p1724_p2, %p1723_p1 }
   0xe   :  { %p1726_p4 = pnand %p1725_p3, %p1719_p0 }
  0x10   :  { %1729 = shalt.err (!%p1726_p4)
}
  0x11   :  { %s1968_s30 = smov 64   ;;  %s1969_s14 = smov 4  }
  0x12   :  { %50 = dma.hbm_to_vmem [thread:$0]  %s2246_s1, 1024, %s45_s26, [#allocation6], %s1968_s30, %s1968_s30, %s1969_s14  }
  0x13   :  { %s1738_s17 = scalar_lea.vmem %s69_s28, 1024  ;;  %p1743_p6 = scmp.lt.s32.totalorder %s69_s28, %s69_s28 }
  0x14   :  { %p1739_p5 = scmp.ne.s32.totalorder %s69_s28, %s1738_s17  ;;  %p1744_p7 = scmp.lt.s32.totalorder %s1738_s17, %s1738_s17 }
  0x16   :  { %p1745_p8 = por %p1744_p7, %p1743_p6 }
  0x18   :  { %p1746_p9 = pnand %p1745_p8, %p1739_p5 }
  0x1a   :  { %1749 = shalt.err (!%p1746_p9)
}
  0x1b   :  { %74 = dma.hbm_to_vmem [thread:$0]  %s2248_s3, 1024, %s69_s28, [#allocation9], %s1968_s30, %s1968_s30, %s1969_s14  }
  0x1c   :  { %s1970_s20 = smov [#allocation11]   ;;  %s1971_s22 = smov [#allocation14]  }
  0x1d   :  { %s92_s21 = sshll.u32 %s1970_s20, 4  ;;  %s116_s23 = sshll.u32 %s1971_s22, 4  ;;  %s93_s21 = int_to_ptr.vmem [resolvable:$true] %s92_s21  ;;  %s117_s23 = int_to_ptr.vmem [resolvable:$true] %s116_s23 }
  0x1e   :  { %s1758_s1 = scalar_lea.vmem %s93_s21, 1024  ;;  %p1763_p11 = scmp.lt.s32.totalorder %s93_s21, %s93_s21 }
  0x1f   :  { %p1759_p10 = scmp.ne.s32.totalorder %s93_s21, %s1758_s1  ;;  %p1764_p12 = scmp.lt.s32.totalorder %s1758_s1, %s1758_s1 }
  0x21   :  { %p1765_p13 = por %p1764_p12, %p1763_p11 }
  0x23   :  { %p1766_p0 = pnand %p1765_p13, %p1759_p10 }
  0x25   :  { %1769 = shalt.err (!%p1766_p0)
}
  0x26   :  { %98 = dma.hbm_to_vmem [thread:$0]  %s2250_s5, 1024, %s93_s21, [#allocation12], %s1968_s30, %s1968_s30, %s1969_s14  }
  0x27   :  { %s1778_s3 = scalar_lea.vmem %s117_s23, 1024  ;;  %p1783_p2 = scmp.lt.s32.totalorder %s117_s23, %s117_s23 }
  0x28   :  { %p1779_p1 = scmp.ne.s32.totalorder %s117_s23, %s1778_s3  ;;  %p1784_p3 = scmp.lt.s32.totalorder %s1778_s3, %s1778_s3 }
  0x2a   :  { %p1785_p4 = por %p1784_p3, %p1783_p2 }
  0x2c   :  { %p1786_p5 = pnand %p1785_p4, %p1779_p1 }
  0x2e   :  { %1789 = shalt.err (!%p1786_p5)
}
  0x2f   :  { %122 = dma.hbm_to_vmem [thread:$0]  %s2252_s7, 1024, %s117_s23, [#allocation15], %s1968_s30, %s1968_s30, %s1969_s14  }
  0x30   :  { %s1972_s28 = smov [#allocation2]   ;;  %s1973_s15 = smov [#allocation7]  }
  0x31   :  { %s32_s29 = sshll.u32 %s1972_s28, 4  ;;  %s56_s16 = sshll.u32 %s1973_s15, 4  ;;  %s33_s29 = int_to_ptr.vmem [resolvable:$true] %s32_s29  ;;  %s57_s16 = int_to_ptr.vmem [resolvable:$true] %s56_s16 }
  0x32   :  { %s1798_s5 = scalar_lea.vmem %s33_s29, 128  ;;  %p1803_p7 = scmp.lt.s32.totalorder %s33_s29, %s33_s29 }
  0x33   :  { %p1799_p6 = scmp.ne.s32.totalorder %s33_s29, %s1798_s5  ;;  %p1804_p8 = scmp.lt.s32.totalorder %s1798_s5, %s1798_s5 }
  0x35   :  { %p1805_p9 = por %p1804_p8, %p1803_p7 }
  0x37   :  { %p1806_p10 = pnand %p1805_p9, %p1799_p6 }
  0x39   :  { %1809 = shalt.err (!%p1806_p10)
}
  0x3a   :  { %38 = dma.hbm_to_vmem [thread:$0]  %s2245_s0, 128, %s33_s29, [#allocation3], %s1968_s30, %s1968_s30, %s1969_s14  }
  0x3b   :  { %s1818_s7 = scalar_lea.vmem %s57_s16, 1024  ;;  %p1823_p12 = scmp.lt.s32.totalorder %s57_s16, %s57_s16 }
  0x3c   :  { %p1819_p11 = scmp.ne.s32.totalorder %s57_s16, %s1818_s7  ;;  %p1824_p13 = scmp.lt.s32.totalorder %s1818_s7, %s1818_s7 }
  0x3e   :  { %p1825_p0 = por %p1824_p13, %p1823_p12 }
  0x40   :  { %p1826_p1 = pnand %p1825_p0, %p1819_p11 }
  0x42   :  { %1829 = shalt.err (!%p1826_p1)
}
  0x43   :  { %62 = dma.hbm_to_vmem [thread:$0]  %s2247_s2, 1024, %s57_s16, [#allocation6], %s1968_s30, %s1968_s30, %s1969_s14  }
  0x44   :  { %s1974_s21 = smov [#allocation10]   ;;  %s1975_s23 = smov [#allocation13]  }
  0x45   :  { %s80_s22 = sshll.u32 %s1974_s21, 4  ;;  %s104_s1 = sshll.u32 %s1975_s23, 4  ;;  %s81_s22 = int_to_ptr.vmem [resolvable:$true] %s80_s22  ;;  %s105_s1 = int_to_ptr.vmem [resolvable:$true] %s104_s1 }
  0x46   :  { %s1838_s0 = scalar_lea.vmem %s81_s22, 1024  ;;  %p1843_p3 = scmp.lt.s32.totalorder %s81_s22, %s81_s22 }
  0x47   :  { %p1839_p2 = scmp.ne.s32.totalorder %s81_s22, %s1838_s0  ;;  %p1844_p4 = scmp.lt.s32.totalorder %s1838_s0, %s1838_s0 }
  0x49   :  { %p1845_p5 = por %p1844_p4, %p1843_p3 }
  0x4b   :  { %p1846_p6 = pnand %p1845_p5, %p1839_p2 }
  0x4d   :  { %1849 = shalt.err (!%p1846_p6)
}
  0x4e   :  { %86 = dma.hbm_to_vmem [thread:$0]  %s2249_s4, 1024, %s81_s22, [#allocation9], %s1968_s30, %s1968_s30, %s1969_s14  }
  0x4f   :  { %s1858_s2 = scalar_lea.vmem %s105_s1, 1024  ;;  %p1863_p8 = scmp.lt.s32.totalorder %s105_s1, %s105_s1 }
  0x50   :  { %p1859_p7 = scmp.ne.s32.totalorder %s105_s1, %s1858_s2  ;;  %p1864_p9 = scmp.lt.s32.totalorder %s1858_s2, %s1858_s2 }
  0x52   :  { %p1865_p10 = por %p1864_p9, %p1863_p8 }
  0x54   :  { %p1866_p11 = pnand %p1865_p10, %p1859_p7 }
  0x56   :  { %1869 = shalt.err (!%p1866_p11)
}
  0x57   :  { %110 = dma.hbm_to_vmem [thread:$0]  %s2251_s6, 1024, %s105_s1, [#allocation12], %s1968_s30, %s1968_s30, %s1969_s14  }
  0x58   :  { %s1976_s27 = smov [#allocation16]   ;;  %s1977_s29 = smov [#allocation17]  }
  0x59   :  { %s128_s28 = sshll.u32 %s1976_s27, 4  ;;  %s142_s15 = sshll.u32 %s1977_s29, 4  ;;  %s129_s28 = int_to_ptr.vmem [resolvable:$true] %s128_s28  ;;  %s143_s15 = int_to_ptr.vmem [resolvable:$true] %s142_s15 }
  0x5a   :  { %s1878_s4 = scalar_lea.vmem %s129_s28, 1024  ;;  %p1883_p13 = scmp.lt.s32.totalorder %s129_s28, %s129_s28 }
  0x5b   :  { %p1879_p12 = scmp.ne.s32.totalorder %s129_s28, %s1878_s4  ;;  %p1884_p0 = scmp.lt.s32.totalorder %s1878_s4, %s1878_s4 }
  0x5d   :  { %p1885_p1 = por %p1884_p0, %p1883_p13 }
  0x5f   :  { %p1886_p2 = pnand %p1885_p1, %p1879_p12 }
  0x61   :  { %1889 = shalt.err (!%p1886_p2)
}
  0x62   :  { %134 = dma.hbm_to_vmem [thread:$0]  %s2253_s8, 1024, %s129_s28, [#allocation15], %s1968_s30, %s1968_s30, %s1969_s14  }
  0x63   :  { %s1898_s6 = scalar_lea.vmem %s143_s15, 2048  ;;  %p1903_p4 = scmp.lt.s32.totalorder %s143_s15, %s143_s15 }
  0x64   :  { %p1899_p3 = scmp.ne.s32.totalorder %s143_s15, %s1898_s6  ;;  %p1904_p5 = scmp.lt.s32.totalorder %s1898_s6, %s1898_s6 }
  0x66   :  { %p1905_p6 = por %p1904_p5, %p1903_p4 }
  0x68   :  { %p1906_p7 = pnand %p1905_p6, %p1899_p3 }
  0x6a   :  { %1909 = shalt.err (!%p1906_p7)
}
  0x6b   :  { %s1978_s17 = smov 128   ;;  %s1979_s18 = smov 8  }
  0x6c   :  { %148 = dma.hbm_to_vmem [thread:$0]  %s2255_s10, 2048, %s143_s15, [#allocation18], %s1978_s17, %s1978_s17, %s1979_s18  }
  0x6d   :  { %1950 = dma.done.wait [#allocation3], 128  }
  0x6e   :  { %1951 = vsyncadd [#allocation3], 4294967168 }
  0x6f   :  { %1952 = dma.done.wait [#allocation6], 2048  }
  0x70   :  { %1953 = vsyncadd [#allocation6], 4294965248 }
  0x71   :  { %1954 = dma.done.wait [#allocation9], 2048  }
  0x72   :  { %1955 = vsyncadd [#allocation9], 4294965248 }
  0x73   :  { %1956 = dma.done.wait [#allocation12], 2048  }
  0x74   :  { %1957 = vsyncadd [#allocation12], 4294965248 }
  0x75   :  { %1958 = dma.done.wait [#allocation15], 2048  }
  0x76   :  { %1959 = vsyncadd [#allocation15], 4294965248 }
  0x77   :  { %1960 = dma.done.wait [#allocation18], 2048  }
  0x78   :  { %1961 = vsyncadd [#allocation18], 4294965248  ;;  %v1980_v0 = vmov 0.0   ;;  %vm1981_vm0 = vmmov 0   ;;  %v1637_v1 = vld [vmem:[#allocation5 + $0x38] sm:$0xff]   ;;  %v1638_v2 = vld [vmem:[#allocation5 + $0x30] sm:$0xff]  }
  0x79   :  { %1424 = vmatprep.subr.bf16.mxu0 %v1980_v0  ;;  %1440 = vmatprep.mubr.msk.bf16.mxu0 %vm1981_vm0, %v1980_v0  ;;  %v1639_v3 = vld [vmem:[#allocation5 + $0x28] sm:$0xff]   ;;  %v1646_v4 = vld [vmem:[#allocation7 + $0x38] sm:$0xff]   ;;  %v1640_v5 = vld [vmem:[#allocation5 + $0x20] sm:$0xff]   ;;  %s1982_s29 = smov [#allocation19]   ;;  %s1983_s4 = smov [#allocation20]  }
  0x7a   :  { %1444 = vmatprep.subr.bf16.mxu1 %v1980_v0  ;;  %1460 = vmatprep.mubr.msk.bf16.mxu1 %vm1981_vm0, %v1980_v0  ;;  %v1647_v6 = vld [vmem:[#allocation7 + $0x30] sm:$0xff]   ;;  %v1641_v7 = vld [vmem:[#allocation5 + $0x18] sm:$0xff]   ;;  %v1648_v8 = vld [vmem:[#allocation7 + $0x28] sm:$0xff]   ;;  %s1227_s15 = sshll.u32 %s1982_s29, 4  ;;  %s1239_s16 = sshll.u32 %s1983_s4, 4  ;;  %s1228_s15 = int_to_ptr.vmem [resolvable:$true] %s1227_s15  ;;  %s1240_s16 = int_to_ptr.vmem [resolvable:$true] %s1239_s16 }
  0x7b   :  { %1425 = vmatpush3.bf16.msra.mxu0 %v1637_v1  ;;  %1445 = vmatpush3.bf16.msra.mxu1 %v1646_v4  ;;  %v1642_v9 = vld [vmem:[#allocation5 + $0x10] sm:$0xff]   ;;  %v1649_v10 = vld [vmem:[#allocation7 + $0x20] sm:$0xff]   ;;  %v1643_v11 = vld [vmem:[#allocation5 + $0x8] sm:$0xff]   ;;  %s1910_s5 = scalar_lea.vmem %s1228_s15, 256  ;;  %p1915_p9 = scmp.lt.s32.totalorder %s1228_s15, %s1228_s15 }
  0x7c   :  { %1426 = vmatprep.subr.bf16.mxu0 %v1980_v0  ;;  %1446 = vmatprep.subr.bf16.mxu1 %v1980_v0  ;;  %v1650_v12 = vld [vmem:[#allocation7 + $0x18] sm:$0xff]   ;;  %v1644_v13 = vld [vmem:[#allocation5] sm:$0xff]   ;;  %v1651_v15 = vld [vmem:[#allocation7 + $0x10] sm:$0xff]   ;;  %p1911_p8 = scmp.ne.s32.totalorder %s1228_s15, %s1910_s5  ;;  %p1916_p10 = scmp.lt.s32.totalorder %s1910_s5, %s1910_s5 }
  0x7d   :  { %v1645_v14 = vld [vmem:[#allocation2] sm:$0xff]   ;;  %v1652_v16 = vld [vmem:[#allocation7 + $0x8] sm:$0xff]   ;;  %v1653_v17 = vld [vmem:[#allocation7] sm:$0xff]  }
  0x7e   :  { %v1654_v18 = vld [vmem:[#allocation8 + $0x38] sm:$0xff]   ;;  %v1655_v19 = vld [vmem:[#allocation8 + $0x30] sm:$0xff]   ;;  %v1656_v20 = vld [vmem:[#allocation8 + $0x28] sm:$0xff]   ;;  %p1917_p11 = por %p1916_p10, %p1915_p9 }
  0x7f   :  { %1427 = vmatpush3.bf16.msra.mxu0 %v1638_v2  ;;  %1447 = vmatpush3.bf16.msra.mxu1 %v1647_v6  ;;  %v1657_v21 = vld [vmem:[#allocation8 + $0x20] sm:$0xff]   ;;  %v1658_v22 = vld [vmem:[#allocation8 + $0x18] sm:$0xff]   ;;  %v1659_v33 = vld [vmem:[#allocation8 + $0x10] sm:$0xff]  }
  0x80   :  { %1428 = vmatprep.subr.bf16.mxu0 %v1980_v0  ;;  %1448 = vmatprep.subr.bf16.mxu1 %v1980_v0  ;;  %v1260_v23 = vld [vmem:[%s2254_s9] ss:$0 sm:$0xff]  ;;  %v1660_v34 = vld [vmem:[#allocation8 + $0x8] sm:$0xff]   ;;  %v1661_v35 = vld [vmem:[#allocation8] sm:$0xff]   ;;  %p1918_p12 = pnand %p1917_p11, %p1911_p8 }
  0x81   :  { %v1662_v36 = vld [vmem:[#allocation10 + $0x38] sm:$0xff]   ;;  %v1663_v37 = vld [vmem:[#allocation10 + $0x30] sm:$0xff]   ;;  %v1664_v38 = vld [vmem:[#allocation10 + $0x28] sm:$0xff]  }
  0x82   :  { %v1665_v39 = vld [vmem:[#allocation10 + $0x20] sm:$0xff]   ;;  %v1666_v40 = vld [vmem:[#allocation10 + $0x18] sm:$0xff]   ;;  %v1667_v51 = vld [vmem:[#allocation10 + $0x10] sm:$0xff]  }
  0x83   :  { %1429 = vmatpush3.bf16.msra.mxu0 %v1639_v3  ;;  %1449 = vmatpush3.bf16.msra.mxu1 %v1648_v8  ;;  %v1270_v41 = vld [vmem:[%s2254_s9 + $0x1] ss:$0 sm:$0xff]  ;;  %v1668_v52 = vld [vmem:[#allocation10 + $0x8] sm:$0xff]   ;;  %v1669_v53 = vld [vmem:[#allocation10] sm:$0xff]  }
  0x84   :  { %1430 = vmatprep.subr.bf16.mxu0 %v1980_v0  ;;  %1450 = vmatprep.subr.bf16.mxu1 %v1980_v0  ;;  %v1670_v54 = vld [vmem:[#allocation11 + $0x38] sm:$0xff]   ;;  %v1671_v55 = vld [vmem:[#allocation11 + $0x30] sm:$0xff]   ;;  %v1672_v56 = vld [vmem:[#allocation11 + $0x28] sm:$0xff]  }
  0x85   :  { %v1673_v57 = vld [vmem:[#allocation11 + $0x20] sm:$0xff]   ;;  %v1674_v58 = vld [vmem:[#allocation11 + $0x18] sm:$0xff]   ;;  %v1675_v59 = vld [vmem:[#allocation11 + $0x10] sm:$0xff]  }
  0x86   :  { %v1279_v60 = vld [vmem:[%s2254_s9 + $0x2] ss:$0 sm:$0xff]  ;;  %v1677_v8 = vld [vmem:[#allocation11] sm:$0xff]  }
  0x87   :  { %1431 = vmatpush3.bf16.msra.mxu0 %v1640_v5  ;;  %1451 = vmatpush3.bf16.msra.mxu1 %v1649_v10 }
  0x88   :  { %1432 = vmatprep.subr.bf16.mxu0 %v1980_v0  ;;  %1452 = vmatprep.subr.bf16.mxu1 %v1980_v0 }
  0x8b   :  { %1433 = vmatpush3.bf16.msra.mxu0 %v1641_v7  ;;  %1453 = vmatpush3.bf16.msra.mxu1 %v1650_v12  ;;  %v1676_v7 = vld [vmem:[#allocation11 + $0x8] sm:$0xff]  }
  0x8c   :  { %1434 = vmatprep.subr.bf16.mxu0 %v1980_v0  ;;  %1454 = vmatprep.subr.bf16.mxu1 %v1980_v0 }
  0x8f   :  { %1435 = vmatpush3.bf16.msra.mxu0 %v1642_v9  ;;  %1455 = vmatpush3.bf16.msra.mxu1 %v1651_v15  ;;  %v1288_v9 = vld [vmem:[%s2254_s9 + $0x3] ss:$0 sm:$0xff] }
  0x90   :  { %1436 = vmatprep.subr.bf16.mxu0 %v1980_v0  ;;  %1456 = vmatprep.subr.bf16.mxu1 %v1980_v0 }
  0x93   :  { %1437 = vmatpush3.bf16.msra.mxu0 %v1643_v11  ;;  %1457 = vmatpush3.bf16.msra.mxu1 %v1652_v16 }
  0x94   :  { %1438 = vmatprep.subr.bf16.mxu0 %v1980_v0  ;;  %1458 = vmatprep.subr.bf16.mxu1 %v1980_v0 }
  0x97   :  { %1439 = vmatpush3.bf16.msra.mxu0 %v1644_v13  ;;  %1459 = vmatpush3.bf16.msra.mxu1 %v1653_v17 }
  0x98   :  { %1464 = vmatprep.subr.bf16.mxu0 %v1980_v0  ;;  %1484 = vmatprep.subr.bf16.mxu1 %v1980_v0 }
  0x9a   :  { %1441 = vmatmul.mubr.bf16.vlgmr.msra.gmra.mxu0 %v1645_v14 }
  0x9b   :  { %1480 = vmatprep.mubr.msk.bf16.mxu0 %vm1981_vm0, %v1980_v0  ;;  %1465 = vmatpush3.bf16.msra.mxu0 %v1654_v18 }
  0x9c   :  { %1466 = vmatprep.subr.bf16.mxu0 %v1980_v0 }
  0x9f   :  { %1467 = vmatpush3.bf16.msra.mxu0 %v1655_v19  ;;  %v1678_v19 = vld [vmem:[#allocation13 + $0x38] sm:$0xff]  }
  0xa0   :  { %1468 = vmatprep.subr.bf16.mxu0 %v1980_v0 }
  0xa3   :  { %1469 = vmatpush3.bf16.msra.mxu0 %v1656_v20  ;;  %v1679_v20 = vld [vmem:[#allocation13 + $0x30] sm:$0xff]  }
  0xa4   :  { %1470 = vmatprep.subr.bf16.mxu0 %v1980_v0 }
  0xa7   :  { %1471 = vmatpush3.bf16.msra.mxu0 %v1657_v21  ;;  %v1680_v21 = vld [vmem:[#allocation13 + $0x28] sm:$0xff]  }
  0xa8   :  { %1472 = vmatprep.subr.bf16.mxu0 %v1980_v0 }
  0xab   :  { %1473 = vmatpush3.bf16.msra.mxu0 %v1658_v22  ;;  %v1681_v22 = vld [vmem:[#allocation13 + $0x20] sm:$0xff]  }
  0xac   :  { %1474 = vmatprep.subr.bf16.mxu0 %v1980_v0 }
  0xaf   :  { %1475 = vmatpush3.bf16.msra.mxu0 %v1659_v33  ;;  %v1297_v33 = vld [vmem:[%s2254_s9 + $0x4] ss:$0 sm:$0xff] }
  0xb0   :  { %1476 = vmatprep.subr.bf16.mxu0 %v1980_v0 }
  0xb3   :  { %1477 = vmatpush3.bf16.msra.mxu0 %v1660_v34 }
  0xb4   :  { %1478 = vmatprep.subr.bf16.mxu0 %v1980_v0 }
  0xb7   :  { %1479 = vmatpush3.bf16.msra.mxu0 %v1661_v35 }
  0xb8   :  { %1504 = vmatprep.subr.bf16.mxu0 %v1980_v0 }
 0x15a   :  { %v293_v24 = vpop.f32.mrf.mxu0 }
 0x15b   :  { %v294_v26 = vadd.f32 %v1260_v23, %v293_v24  ;;  %v1683_v24 = vld [vmem:[#allocation13 + $0x10] sm:$0xff]  }
 0x15c   :  { %v1442_v25 = vpop.f32.mrf.mxu0 }
 0x15d   :  { %v300_v30 = vmax.f32 %v294_v26, 0.0  ;;  %v1684_v25 = vld [vmem:[#allocation13 + $0x8] sm:$0xff]   ;;  %v1685_v26 = vld [vmem:[#allocation13] sm:$0xff]  }
 0x15e   :  { %v296_v27 = vpop.f32.mrf.mxu0 }
 0x15f   :  { %v297_v28 = vadd.f32 %v1260_v23, %v296_v27  ;;  %v1682_v23 = vld [vmem:[#allocation13 + $0x18] sm:$0xff]  }
 0x160   :  { %v1443_v29 = vpop.f32.mrf.mxu0  ;;  %v1686_v27 = vld [vmem:[#allocation14 + $0x38] sm:$0xff]  }
 0x161   :  { %v301_v31 = vmax.f32 %v297_v28, 0.0  ;;  %v1687_v28 = vld [vmem:[#allocation14 + $0x30] sm:$0xff]   ;;  %v1688_v29 = vld [vmem:[#allocation14 + $0x28] sm:$0xff]  }
 0x163   :  { %v302_v32 = vpack.c.bf16 %v301_v31, %v300_v30  ;;  %v1689_v30 = vld [vmem:[#allocation14 + $0x20] sm:$0xff]   ;;  %v1690_v31 = vld [vmem:[#allocation14 + $0x18] sm:$0xff]  }
 0x165   :  { %1461 = vmatmul.mubr.bf16.vlgmr.msra.gmra.mxu1 %v302_v32  ;;  %v1691_v32 = vld [vmem:[#allocation14 + $0x10] sm:$0xff]  }
 0x166   :  { %1500 = vmatprep.mubr.msk.bf16.mxu1 %vm1981_vm0, %v1980_v0  ;;  %1485 = vmatpush3.bf16.msra.mxu1 %v1662_v36 }
 0x167   :  { %1486 = vmatprep.subr.bf16.mxu1 %v1980_v0 }
 0x16a   :  { %1487 = vmatpush3.bf16.msra.mxu1 %v1663_v37 }
 0x16b   :  { %1488 = vmatprep.subr.bf16.mxu1 %v1980_v0 }
 0x16e   :  { %1489 = vmatpush3.bf16.msra.mxu1 %v1664_v38 }
 0x16f   :  { %1490 = vmatprep.subr.bf16.mxu1 %v1980_v0 }
 0x172   :  { %1491 = vmatpush3.bf16.msra.mxu1 %v1665_v39 }
 0x173   :  { %1492 = vmatprep.subr.bf16.mxu1 %v1980_v0 }
 0x176   :  { %1493 = vmatpush3.bf16.msra.mxu1 %v1666_v40 }
 0x177   :  { %1494 = vmatprep.subr.bf16.mxu1 %v1980_v0 }
 0x17a   :  { %1495 = vmatpush3.bf16.msra.mxu1 %v1667_v51  ;;  %v1306_v51 = vld [vmem:[%s2254_s9 + $0x5] ss:$0 sm:$0xff] }
 0x17b   :  { %1496 = vmatprep.subr.bf16.mxu1 %v1980_v0 }
 0x17e   :  { %1497 = vmatpush3.bf16.msra.mxu1 %v1668_v52 }
 0x17f   :  { %1498 = vmatprep.subr.bf16.mxu1 %v1980_v0 }
 0x182   :  { %1499 = vmatpush3.bf16.msra.mxu1 %v1669_v53 }
 0x183   :  { %1524 = vmatprep.subr.bf16.mxu1 %v1980_v0 }
 0x225   :  { %v406_v42 = vpop.f32.mrf.mxu1 }
 0x226   :  { %v407_v44 = vadd.f32 %v1270_v41, %v406_v42 }
 0x227   :  { %v1462_v43 = vpop.f32.mrf.mxu1 }
 0x228   :  { %v413_v48 = vmax.f32 %v407_v44, 0.0  ;;  %v1692_v43 = vld [vmem:[#allocation14 + $0x8] sm:$0xff]   ;;  %v1693_v44 = vld [vmem:[#allocation14] sm:$0xff]  }
 0x229   :  { %v409_v45 = vpop.f32.mrf.mxu1 }
 0x22a   :  { %v410_v46 = vadd.f32 %v1270_v41, %v409_v45  ;;  %v1106_v45 = vld [vmem:[#allocation17 + $0x78] sm:$0xff] }
 0x22b   :  { %v1463_v47 = vpop.f32.mrf.mxu1 }
 0x22c   :  { %v414_v49 = vmax.f32 %v410_v46, 0.0  ;;  %v1694_v46 = vld [vmem:[#allocation16 + $0x38] sm:$0xff]   ;;  %v1695_v47 = vld [vmem:[#allocation16 + $0x30] sm:$0xff]  }
 0x22e   :  { %v415_v50 = vpack.c.bf16 %v414_v49, %v413_v48  ;;  %v1696_v48 = vld [vmem:[#allocation16 + $0x28] sm:$0xff]   ;;  %v1697_v49 = vld [vmem:[#allocation16 + $0x20] sm:$0xff]  }
 0x230   :  { %1481 = vmatmul.mubr.bf16.vlgmr.msra.gmra.mxu0 %v415_v50  ;;  %v1698_v50 = vld [vmem:[#allocation16 + $0x18] sm:$0xff]  }
 0x231   :  { %1520 = vmatprep.mubr.msk.bf16.mxu0 %vm1981_vm0, %v1980_v0  ;;  %1505 = vmatpush3.bf16.msra.mxu0 %v1670_v54 }
 0x232   :  { %1506 = vmatprep.subr.bf16.mxu0 %v1980_v0 }
 0x235   :  { %1507 = vmatpush3.bf16.msra.mxu0 %v1671_v55 }
 0x236   :  { %1508 = vmatprep.subr.bf16.mxu0 %v1980_v0 }
 0x239   :  { %1509 = vmatpush3.bf16.msra.mxu0 %v1672_v56 }
 0x23a   :  { %1510 = vmatprep.subr.bf16.mxu0 %v1980_v0 }
 0x23d   :  { %1511 = vmatpush3.bf16.msra.mxu0 %v1673_v57 }
 0x23e   :  { %1512 = vmatprep.subr.bf16.mxu0 %v1980_v0 }
 0x241   :  { %1513 = vmatpush3.bf16.msra.mxu0 %v1674_v58 }
 0x242   :  { %1514 = vmatprep.subr.bf16.mxu0 %v1980_v0 }
 0x245   :  { %1515 = vmatpush3.bf16.msra.mxu0 %v1675_v59 }
 0x246   :  { %1516 = vmatprep.subr.bf16.mxu0 %v1980_v0 }
 0x249   :  { %1517 = vmatpush3.bf16.msra.mxu0 %v1676_v7  ;;  %v1096_v7 = vld [vmem:[#allocation17 + $0x28] sm:$0xff] }
 0x24a   :  { %1518 = vmatprep.subr.bf16.mxu0 %v1980_v0 }
 0x24d   :  { %1519 = vmatpush3.bf16.msra.mxu0 %v1677_v8  ;;  %v1095_v8 = vld [vmem:[#allocation17 + $0x20] sm:$0xff] }
 0x24e   :  { %1544 = vmatprep.subr.bf16.mxu0 %v1980_v0 }
 0x2f0   :  { %v519_v61 = vpop.f32.mrf.mxu0 }
 0x2f1   :  { %v520_v63 = vadd.f32 %v1279_v60, %v519_v61  ;;  %v1105_v61 = vld [vmem:[#allocation17 + $0x70] sm:$0xff] }
 0x2f2   :  { %v1482_v62 = vpop.f32.mrf.mxu0 }
 0x2f3   :  { %v526_v4 = vmax.f32 %v520_v63, 0.0  ;;  %v1104_v62 = vld [vmem:[#allocation17 + $0x68] sm:$0xff]  ;;  %v1103_v63 = vld [vmem:[#allocation17 + $0x60] sm:$0xff] }
 0x2f4   :  { %v522_v1 = vpop.f32.mrf.mxu0 }
 0x2f5   :  { %v523_v2 = vadd.f32 %v1279_v60, %v522_v1  ;;  %v1102_v1 = vld [vmem:[#allocation17 + $0x58] sm:$0xff] }
 0x2f6   :  { %v1483_v3 = vpop.f32.mrf.mxu0 }
 0x2f7   :  { %v527_v5 = vmax.f32 %v523_v2, 0.0  ;;  %v1101_v2 = vld [vmem:[#allocation17 + $0x50] sm:$0xff]  ;;  %v1100_v3 = vld [vmem:[#allocation17 + $0x48] sm:$0xff] }
 0x2f9   :  { %v528_v6 = vpack.c.bf16 %v527_v5, %v526_v4  ;;  %v1099_v4 = vld [vmem:[#allocation17 + $0x40] sm:$0xff]  ;;  %v1098_v5 = vld [vmem:[#allocation17 + $0x38] sm:$0xff] }
 0x2fb   :  { %1501 = vmatmul.mubr.bf16.vlgmr.msra.gmra.mxu1 %v528_v6  ;;  %v1097_v6 = vld [vmem:[#allocation17 + $0x30] sm:$0xff] }
 0x2fc   :  { %1540 = vmatprep.mubr.msk.bf16.mxu1 %vm1981_vm0, %v1980_v0  ;;  %1525 = vmatpush3.bf16.msra.mxu1 %v1678_v19 }
 0x2fd   :  { %1526 = vmatprep.subr.bf16.mxu1 %v1980_v0 }
 0x300   :  { %1527 = vmatpush3.bf16.msra.mxu1 %v1679_v20 }
 0x301   :  { %1528 = vmatprep.subr.bf16.mxu1 %v1980_v0 }
 0x304   :  { %1529 = vmatpush3.bf16.msra.mxu1 %v1680_v21 }
 0x305   :  { %1530 = vmatprep.subr.bf16.mxu1 %v1980_v0 }
 0x308   :  { %1531 = vmatpush3.bf16.msra.mxu1 %v1681_v22 }
 0x309   :  { %1532 = vmatprep.subr.bf16.mxu1 %v1980_v0 }
 0x30c   :  { %1533 = vmatpush3.bf16.msra.mxu1 %v1682_v23 }
 0x30d   :  { %1534 = vmatprep.subr.bf16.mxu1 %v1980_v0 }
 0x310   :  { %1535 = vmatpush3.bf16.msra.mxu1 %v1683_v24 }
 0x311   :  { %1536 = vmatprep.subr.bf16.mxu1 %v1980_v0 }
 0x314   :  { %1537 = vmatpush3.bf16.msra.mxu1 %v1684_v25 }
 0x315   :  { %1538 = vmatprep.subr.bf16.mxu1 %v1980_v0 }
 0x318   :  { %1539 = vmatpush3.bf16.msra.mxu1 %v1685_v26 }
 0x319   :  { %1564 = vmatprep.subr.bf16.mxu1 %v1980_v0 }
 0x3bb   :  { %v632_v10 = vpop.f32.mrf.mxu1 }
 0x3bc   :  { %v2180_v11 = vadd.f32 %v1288_v9, %v632_v10  ;;  %v1093_v10 = vld [vmem:[#allocation17 + $0x10] sm:$0xff] }
 0x3bd   :  { %v1502_v12 = vpop.f32.mrf.mxu1 }
 0x3be   :  { %v1107_v13 = vmul.f32 %v2180_v11, %v2180_v11  ;;  %v1091_v12 = vld [vmem:[#allocation17] sm:$0xff] }
 0x3bf   :  { %v635_v14 = vpop.f32.mrf.mxu1 }
 0x3c0   :  { %v2184_v15 = vadd.f32 %v1288_v9, %v635_v14  ;;  %1109 = vadd.xlane.f32.xlu0 %v1107_v13  ;;  %v1094_v9 = vld [vmem:[#allocation17 + $0x18] sm:$0xff]  ;;  %v1699_v13 = vld [vmem:[#allocation16 + $0x10] sm:$0xff]   ;;  %v1700_v14 = vld [vmem:[#allocation16 + $0x8] sm:$0xff]  }
 0x3c1   :  { %v1503_v16 = vpop.f32.mrf.mxu1 }
 0x3c2   :  { %v639_v17 = vpack.c.bf16 %v2184_v15, %v2180_v11  ;;  %v1108_v18 = vmul.f32 %v2184_v15, %v2184_v15  ;;  %v1701_v16 = vld [vmem:[#allocation16] sm:$0xff]  }
 0x3c4   :  { %1111 = vadd.xlane.f32.xlu0 %v1108_v18  ;;  %1521 = vmatmul.mubr.bf16.vlgmr.msra.gmra.mxu0 %v639_v17  ;;  %v1315_v17 = vld [vmem:[%s2254_s9 + $0x6] ss:$0 sm:$0xff] }
 0x3c5   :  { %1560 = vmatprep.mubr.msk.bf16.mxu0 %vm1981_vm0, %v1980_v0  ;;  %1545 = vmatpush3.bf16.msra.mxu0 %v1686_v27 }
 0x3c6   :  { %1546 = vmatprep.subr.bf16.mxu0 %v1980_v0 }
 0x3c9   :  { %1547 = vmatpush3.bf16.msra.mxu0 %v1687_v28 }
 0x3ca   :  { %1548 = vmatprep.subr.bf16.mxu0 %v1980_v0 }
 0x3cd   :  { %1549 = vmatpush3.bf16.msra.mxu0 %v1688_v29 }
 0x3ce   :  { %1550 = vmatprep.subr.bf16.mxu0 %v1980_v0 }
 0x3d1   :  { %1551 = vmatpush3.bf16.msra.mxu0 %v1689_v30 }
 0x3d2   :  { %1552 = vmatprep.subr.bf16.mxu0 %v1980_v0 }
 0x3d5   :  { %1553 = vmatpush3.bf16.msra.mxu0 %v1690_v31 }
 0x3d6   :  { %1554 = vmatprep.subr.bf16.mxu0 %v1980_v0 }
 0x3d9   :  { %1555 = vmatpush3.bf16.msra.mxu0 %v1691_v32 }
 0x3da   :  { %1556 = vmatprep.subr.bf16.mxu0 %v1980_v0 }
 0x3dd   :  { %1557 = vmatpush3.bf16.msra.mxu0 %v1692_v43 }
 0x3de   :  { %1558 = vmatprep.subr.bf16.mxu0 %v1980_v0 }
 0x3e1   :  { %1559 = vmatpush3.bf16.msra.mxu0 %v1693_v44 }
 0x3e2   :  { %1584 = vmatprep.subr.mxu0 %v1106_v45 }
 0x449   :  { %v1110_v26 = vpop.xlane.xlu0 %1109 }
 0x44d   :  { %v1112_v27 = vpop.xlane.xlu0 %1111 }
 0x484   :  { %v743_v34 = vpop.f32.mrf.mxu0 }
 0x485   :  { %v744_v36 = vadd.f32 %v1297_v33, %v743_v34 }
 0x486   :  { %v1522_v35 = vpop.f32.mrf.mxu0 }
 0x487   :  { %v750_v40 = vmax.f32 %v744_v36, 0.0 }
 0x488   :  { %v746_v37 = vpop.f32.mrf.mxu0 }
 0x489   :  { %v747_v38 = vadd.f32 %v1297_v33, %v746_v37 }
 0x48a   :  { %v1523_v39 = vpop.f32.mrf.mxu0 }
 0x48b   :  { %v751_v41 = vmax.f32 %v747_v38, 0.0 }
 0x48d   :  { %v752_v42 = vpack.c.bf16 %v751_v41, %v750_v40  ;;  %v1207_v40 = vlaneseq }
 0x48f   :  { %1541 = vmatmul.mubr.bf16.vlgmr.msra.gmra.mxu1 %v752_v42  ;;  %v1208_v41 = vand.u32 127, %v1207_v40 }
 0x490   :  { %1580 = vmatprep.mubr.msk.bf16.mxu1 %vm1981_vm0, %v1980_v0  ;;  %1565 = vmatpush3.bf16.msra.mxu1 %v1694_v46 }
 0x491   :  { %1566 = vmatprep.subr.bf16.mxu1 %v1980_v0  ;;  %vm1209_vm1 = vcmp.lt.s32.totalorder %v1208_v41, 8 }
 0x494   :  { %1567 = vmatpush3.bf16.msra.mxu1 %v1695_v47 }
 0x495   :  { %1568 = vmatprep.subr.bf16.mxu1 %v1980_v0 }
 0x498   :  { %1569 = vmatpush3.bf16.msra.mxu1 %v1696_v48  ;;  %v1324_v48 = vld [vmem:[%s2254_s9 + $0x7] ss:$0 sm:$0xff] }
 0x499   :  { %1570 = vmatprep.subr.bf16.mxu1 %v1980_v0 }
 0x49c   :  { %1571 = vmatpush3.bf16.msra.mxu1 %v1697_v49 }
 0x49d   :  { %1572 = vmatprep.subr.bf16.mxu1 %v1980_v0 }
 0x4a0   :  { %1573 = vmatpush3.bf16.msra.mxu1 %v1698_v50 }
 0x4a1   :  { %1574 = vmatprep.subr.bf16.mxu1 %v1980_v0 }
 0x4a4   :  { %1575 = vmatpush3.bf16.msra.mxu1 %v1699_v13 }
 0x4a5   :  { %1576 = vmatprep.subr.bf16.mxu1 %v1980_v0 }
 0x4a8   :  { %1577 = vmatpush3.bf16.msra.mxu1 %v1700_v14 }
 0x4a9   :  { %1578 = vmatprep.subr.bf16.mxu1 %v1980_v0  ;;  %v1333_v0 = vld [vmem:[%s2256_s11] ss:$0 sm:$0xff] }
 0x4aa   :  { %v1196_v29 = vadd.f32 %v1333_v0, %v1112_v27  ;;  %v1195_v32 = vadd.f32 %v1333_v0, %v1110_v26 }
 0x4ac   :  { %1579 = vmatpush3.bf16.msra.mxu1 %v1701_v16 }
 0x54f   :  { %v856_v52 = vpop.f32.mrf.mxu1 }
 0x550   :  { %v857_v54 = vadd.f32 %v1306_v51, %v856_v52 }
 0x551   :  { %v1542_v53 = vpop.f32.mrf.mxu1 }
 0x552   :  { %v863_v58 = vmax.f32 %v857_v54, 0.0 }
 0x553   :  { %v859_v55 = vpop.f32.mrf.mxu1 }
 0x554   :  { %v860_v56 = vadd.f32 %v1306_v51, %v859_v55 }
 0x555   :  { %v1543_v57 = vpop.f32.mrf.mxu1 }
 0x556   :  { %v864_v59 = vmax.f32 %v860_v56, 0.0 }
 0x558   :  { %v865_v60 = vpack.c.bf16 %v864_v59, %v863_v58 }
 0x55a   :  { %1561 = vmatmul.mubr.bf16.vlgmr.msra.gmra.mxu0 %v865_v60 }
 0x55b   :  { %1585 = vmatpush3.msra.mxu0 %v1106_v45  ;;  %1616 = vmatprep.mubr.f32.mxu0 %v2180_v11  ;;  %v1092_v11 = vld [vmem:[#allocation17 + $0x8] sm:$0xff] }
 0x55c   :  { %1586 = vmatprep.subr.mxu0 %v1105_v61 }
 0x55d   :  { %1587 = vmatpush3.msra.mxu0 %v1105_v61 }
 0x55e   :  { %1588 = vmatprep.subr.mxu0 %v1104_v62 }
 0x55f   :  { %1589 = vmatpush3.msra.mxu0 %v1104_v62 }
 0x560   :  { %1590 = vmatprep.subr.mxu0 %v1103_v63 }
 0x561   :  { %1591 = vmatpush3.msra.mxu0 %v1103_v63 }
 0x562   :  { %1592 = vmatprep.subr.mxu0 %v1102_v1 }
 0x563   :  { %1593 = vmatpush3.msra.mxu0 %v1102_v1 }
 0x564   :  { %1594 = vmatprep.subr.mxu0 %v1101_v2 }
 0x565   :  { %1595 = vmatpush3.msra.mxu0 %v1101_v2 }
 0x566   :  { %1596 = vmatprep.subr.mxu0 %v1100_v3 }
 0x567   :  { %1597 = vmatpush3.msra.mxu0 %v1100_v3 }
 0x568   :  { %1598 = vmatprep.subr.mxu0 %v1099_v4 }
 0x569   :  { %1599 = vmatpush3.msra.mxu0 %v1099_v4 }
 0x56a   :  { %1600 = vmatprep.subr.mxu0 %v1098_v5 }
 0x56b   :  { %1601 = vmatpush3.msra.mxu0 %v1098_v5 }
 0x56c   :  { %1602 = vmatprep.subr.mxu0 %v1097_v6 }
 0x56d   :  { %1603 = vmatpush3.msra.mxu0 %v1097_v6 }
 0x56e   :  { %1604 = vmatprep.subr.mxu0 %v1096_v7 }
 0x56f   :  { %1605 = vmatpush3.msra.mxu0 %v1096_v7 }
 0x570   :  { %1606 = vmatprep.subr.mxu0 %v1095_v8 }
 0x571   :  { %1607 = vmatpush3.msra.mxu0 %v1095_v8 }
 0x572   :  { %1608 = vmatprep.subr.mxu0 %v1094_v9 }
 0x573   :  { %1609 = vmatpush3.msra.mxu0 %v1094_v9 }
 0x574   :  { %1610 = vmatprep.subr.mxu0 %v1093_v10 }
 0x575   :  { %1611 = vmatpush3.msra.mxu0 %v1093_v10 }
 0x576   :  { %1612 = vmatprep.subr.mxu0 %v1092_v11 }
 0x577   :  { %1613 = vmatpush3.msra.mxu0 %v1092_v11 }
 0x578   :  { %1614 = vmatprep.subr.mxu0 %v1091_v12 }
 0x579   :  { %1615 = vmatpush3.msra.mxu0 %v1091_v12 }
 0x57a   :  { %1617 = vmatmul.mubr.f32.vlgmr.msra.gmra.mxu0 %v2184_v15 }
 0x61a   :  { %v969_v18 = vpop.f32.mrf.mxu0 }
 0x61b   :  { %v970_v20 = vadd.f32 %v1315_v17, %v969_v18 }
 0x61c   :  { %v1562_v19 = vpop.f32.mrf.mxu0 }
 0x61d   :  { %v976_v23 = vmax.f32 %v970_v20, 0.0 }
 0x61e   :  { %v972_v21 = vpop.f32.mrf.mxu0 }
 0x61f   :  { %v973_v22 = vadd.f32 %v1315_v17, %v972_v21 }
 0x620   :  { %v1563_v15 = vpop.f32.mrf.mxu0 }
 0x621   :  { %v977_v24 = vmax.f32 %v973_v22, 0.0 }
 0x623   :  { %v978_v25 = vpack.c.bf16 %v977_v24, %v976_v23 }
 0x625   :  { %1581 = vmatmul.mubr.bf16.vlgmr.msra.gmra.mxu1 %v978_v25 }
 0x63a   :  { %v1618_v28 = vpop.f32.mrf.mxu0 }
 0x63b   :  { %v1198_v30 = vmul.f32 2.0, %v1618_v28 }
 0x63c   :  { %v1179_v31 = vpop.f32.mrf.mxu0 }
 0x63d   :  { %v1200_v33 = vsub.f32 %v1196_v29, %v1198_v30  ;;  %v1197_v34 = vmul.f32 2.0, %v1179_v31 }
 0x63f   :  { %v1202_v35 = vmax.f32 %v1200_v33, 0.0  ;;  %v1199_v36 = vsub.f32 %v1195_v32, %v1197_v34 }
 0x641   :  { %v1201_v37 = vmax.f32 %v1199_v36, 0.0  ;;  %v1204_v38 = vadd.f32 1.0, %v1202_v35 }
 0x643   :  { %v1203_v39 = vadd.f32 1.0, %v1201_v37 }
 0x645   :  { %1702 = vrcp.f32 %v1203_v39 }
 0x646   :  { %1704 = vrcp.f32 %v1204_v38 }
 0x652   :  { %v1703_v42 = vpop.eup %1702 }
 0x653   :  { %v1210_v43 = vsel %vm1209_vm1, %v1703_v42, 0.0  ;;  %v1705_v44 = vpop.eup %1704 }
 0x654   :  { %1212 = vadd.xlane.f32.xlu1 %v1210_v43  ;;  %v1211_v45 = vsel %vm1209_vm1, %v1705_v44, 0.0 }
 0x658   :  { %1214 = vadd.xlane.f32.xlu1 %v1211_v45 }
 0x6dd   :  { %v1213_v46 = vpop.xlane.xlu1 %1212 }
 0x6de   :  { %1706 = vrcp.f32 %v1213_v46 }
 0x6e1   :  { %v1215_v47 = vpop.xlane.xlu1 %1214 }
 0x6e2   :  { %1708 = vrcp.f32 %v1215_v47 }
 0x6e5   :  { %v1082_v49 = vpop.f32.mrf.mxu1 }
 0x6e6   :  { %v1083_v50 = vadd.f32 %v1324_v48, %v1082_v49 }
 0x6e7   :  { %v1582_v51 = vpop.f32.mrf.mxu1 }
 0x6e8   :  { %1089 = vst [vmem:[#allocation19] sm:$0xff] %v1083_v50 }
 0x6e9   :  { %v1085_v52 = vpop.f32.mrf.mxu1 }
 0x6ea   :  { %v1086_v53 = vadd.f32 %v1324_v48, %v1085_v52 }
 0x6eb   :  { %v1707_v54 = vpop.eup %1706  ;;  %v1583_v55 = vpop.f32.mrf.mxu1 }
 0x6ec   :  { %1090 = vst [vmem:[#allocation19 + $0x8] sm:$0xff] %v1086_v53  ;;  %v1217_v56 = vmul.f32 %v1707_v54, %v1210_v43 }
 0x6ed   :  { %1921 = shalt.err (!%p1918_p12)
}
 0x6ee   :  { %1233 = dma.vmem_to_hbm [thread:$0]  %s1228_s15, 256, %s2257_s12, [#allocation4], %s1978_s17, %s1978_s17, %s1979_s18   ;;  %1220 = vst [vmem:[#allocation20] sm:$0xff] %v1217_v56 }
 0x6ef   :  { %v1709_v57 = vpop.eup %1708  ;;  %s1930_s7 = scalar_lea.vmem %s1240_s16, 256  ;;  %p1935_p0 = scmp.lt.s32.totalorder %s1240_s16, %s1240_s16 }
 0x6f0   :  { %v1219_v58 = vmul.f32 %v1709_v57, %v1211_v45  ;;  %p1931_p13 = scmp.ne.s32.totalorder %s1240_s16, %s1930_s7  ;;  %p1936_p1 = scmp.lt.s32.totalorder %s1930_s7, %s1930_s7 }
 0x6f2   :  { %1221 = vst [vmem:[#allocation20 + $0x8] sm:$0xff] %v1219_v58  ;;  %p1937_p2 = por %p1936_p1, %p1935_p0 }
 0x6f4   :  { %p1938_p3 = pnand %p1937_p2, %p1931_p13 }
 0x6f6   :  { %1941 = shalt.err (!%p1938_p3)
}
 0x6f7   :  { %1245 = dma.vmem_to_hbm [thread:$0]  %s1240_s16, 256, %s2258_s13, [#allocation21], %s1978_s17, %s1978_s17, %s1979_s18  }
 0x6f8   :  { %1962 = dma.done.wait [#allocation4], 256  }
 0x6f9   :  { %1963 = vsyncadd [#allocation4], 4294967040 }
 0x6fa   :  { %1964 = dma.done.wait [#allocation21], 256  }
 0x6fb   :  { %1965 = vsyncadd [#allocation21], 4294967040 }
 0x6fc   :  { %1252 = vsyncpa [#allocation3], 1 }
 0x6fd   :  { %1253 = vsyncpa [#allocation6], 1 }
 0x6fe   :  { %1254 = vsyncpa [#allocation9], 1 }
 0x6ff   :  { %1255 = vsyncpa [#allocation12], 1 }
 0x700   :  { %1256 = vsyncpa [#allocation15], 1 }
 0x701   :  { %1257 = vsyncpa [#allocation18], 1 }
 0x702   :  { %1258 = vsyncpa [#allocation4], 1 }
 0x703   :  { %1259 = vsyncpa [#allocation21], 1 }

// kernel: tpu_custom_call.1
= control target key start
LH: loop header
LB: loop body
LE: loop exit
PB: predicated region body
PF: predicated region fallthrough
CT: control target
= control target key end

     0   :  { %19 = vsyncpa [#allocation3], 0  ;;  %s2245_s0 = inlined_call_operand.hbm [shape: bf16[16,128], index: 0, kind: input, shape index: {}]   ;;  %s2246_s1 = inlined_call_operand.hbm [shape: bf16[128,128], index: 1, kind: input, shape index: {}]   ;;  %s2247_s2 = inlined_call_operand.hbm [shape: bf16[128,128], index: 2, kind: input, shape index: {}]   ;;  %s2248_s3 = inlined_call_operand.hbm [shape: bf16[128,128], index: 3, kind: input, shape index: {}]   ;;  %s2249_s4 = inlined_call_operand.hbm [shape: bf16[128,128], index: 4, kind: input, shape index: {}]   ;;  %s2250_s5 = inlined_call_operand.hbm [shape: bf16[128,128], index: 5, kind: input, shape index: {}]   ;;  %s2251_s6 = inlined_call_operand.hbm [shape: bf16[128,128], index: 6, kind: input, shape index: {}]   ;;  %s2252_s7 = inlined_call_operand.hbm [shape: bf16[128,128], index: 7, kind: input, shape index: {}]   ;;  %s2253_s8 = inlined_call_operand.hbm [shape: bf16[128,128], index: 8, kind: input, shape index: {}]   ;;  %s2254_s9 = inlined_call_operand.vmem [shape: f32[8,128], index: 9, kind: input, shape index: {}]   ;;  %s2255_s10 = inlined_call_operand.hbm [shape: f32[128,128], index: 10, kind: input, shape index: {}]   ;;  %s2256_s11 = inlined_call_operand.vmem [shape: f32[1,128], index: 11, kind: input, shape index: {}]   ;;  %s2257_s12 = inlined_call_operand.hbm [shape: f32[16,128], index: 12, kind: output, shape index: {0}]   ;;  %s2258_s13 = inlined_call_operand.hbm [shape: f32[16,128], index: 13, kind: output, shape index: {1}]  }
   0x1   :  { %20 = vsyncpa [#allocation6], 0 }
   0x2   :  { %21 = vsyncpa [#allocation9], 0 }
   0x3   :  { %22 = vsyncpa [#allocation12], 0 }
   0x4   :  { %23 = vsyncpa [#allocation15], 0 }
   0x5   :  { %24 = vsyncpa [#allocation18], 0 }
   0x6   :  { %25 = vsyncpa [#allocation4], 0 }
   0x7   :  { %26 = vsyncpa [#allocation21], 0  ;;  %s1966_s25 = smov [#allocation5]   ;;  %s1967_s27 = smov [#allocation8]  }
   0x8   :  { %s44_s26 = sshll.u32 %s1966_s25, 4  ;;  %s68_s28 = sshll.u32 %s1967_s27, 4  ;;  %s45_s26 = int_to_ptr.vmem [resolvable:$true] %s44_s26  ;;  %s69_s28 = int_to_ptr.vmem [resolvable:$true] %s68_s28 }
   0x9   :  { %s1718_s29 = scalar_lea.vmem %s45_s26, 1024  ;;  %p1723_p1 = scmp.lt.s32.totalorder %s45_s26, %s45_s26 }
   0xa   :  { %p1719_p0 = scmp.ne.s32.totalorder %s45_s26, %s1718_s29  ;;  %p1724_p2 = scmp.lt.s32.totalorder %s1718_s29, %s1718_s29 }
   0xc   :  { %p1725_p3 = por %p1724_p2, %p1723_p1 }
   0xe   :  { %p1726_p4 = pnand %p1725_p3, %p1719_p0 }
  0x10   :  { %1729 = shalt.err (!%p1726_p4)
}
  0x11   :  { %s1968_s30 = smov 64   ;;  %s1969_s14 = smov 4  }
  0x12   :  { %50 = dma.hbm_to_vmem [thread:$0]  %s2246_s1, 1024, %s45_s26, [#allocation6], %s1968_s30, %s1968_s30, %s1969_s14  }
  0x13   :  { %s1738_s17 = scalar_lea.vmem %s69_s28, 1024  ;;  %p1743_p6 = scmp.lt.s32.totalorder %s69_s28, %s69_s28 }
  0x14   :  { %p1739_p5 = scmp.ne.s32.totalorder %s69_s28, %s1738_s17  ;;  %p1744_p7 = scmp.lt.s32.totalorder %s1738_s17, %s1738_s17 }
  0x16   :  { %p1745_p8 = por %p1744_p7, %p1743_p6 }
  0x18   :  { %p1746_p9 = pnand %p1745_p8, %p1739_p5 }
  0x1a   :  { %1749 = shalt.err (!%p1746_p9)
}
  0x1b   :  { %74 = dma.hbm_to_vmem [thread:$0]  %s2248_s3, 1024, %s69_s28, [#allocation9], %s1968_s30, %s1968_s30, %s1969_s14  }
  0x1c   :  { %s1970_s20 = smov [#allocation11]   ;;  %s1971_s22 = smov [#allocation14]  }
  0x1d   :  { %s92_s21 = sshll.u32 %s1970_s20, 4  ;;  %s116_s23 = sshll.u32 %s1971_s22, 4  ;;  %s93_s21 = int_to_ptr.vmem [resolvable:$true] %s92_s21  ;;  %s117_s23 = int_to_ptr.vmem [resolvable:$true] %s116_s23 }
  0x1e   :  { %s1758_s1 = scalar_lea.vmem %s93_s21, 1024  ;;  %p1763_p11 = scmp.lt.s32.totalorder %s93_s21, %s93_s21 }
  0x1f   :  { %p1759_p10 = scmp.ne.s32.totalorder %s93_s21, %s1758_s1  ;;  %p1764_p12 = scmp.lt.s32.totalorder %s1758_s1, %s1758_s1 }
  0x21   :  { %p1765_p13 = por %p1764_p12, %p1763_p11 }
  0x23   :  { %p1766_p0 = pnand %p1765_p13, %p1759_p10 }
  0x25   :  { %1769 = shalt.err (!%p1766_p0)
}
  0x26   :  { %98 = dma.hbm_to_vmem [thread:$0]  %s2250_s5, 1024, %s93_s21, [#allocation12], %s1968_s30, %s1968_s30, %s1969_s14  }
  0x27   :  { %s1778_s3 = scalar_lea.vmem %s117_s23, 1024  ;;  %p1783_p2 = scmp.lt.s32.totalorder %s117_s23, %s117_s23 }
  0x28   :  { %p1779_p1 = scmp.ne.s32.totalorder %s117_s23, %s1778_s3  ;;  %p1784_p3 = scmp.lt.s32.totalorder %s1778_s3, %s1778_s3 }
  0x2a   :  { %p1785_p4 = por %p1784_p3, %p1783_p2 }
  0x2c   :  { %p1786_p5 = pnand %p1785_p4, %p1779_p1 }
  0x2e   :  { %1789 = shalt.err (!%p1786_p5)
}
  0x2f   :  { %122 = dma.hbm_to_vmem [thread:$0]  %s2252_s7, 1024, %s117_s23, [#allocation15], %s1968_s30, %s1968_s30, %s1969_s14  }
  0x30   :  { %s1972_s28 = smov [#allocation2]   ;;  %s1973_s15 = smov [#allocation7]  }
  0x31   :  { %s32_s29 = sshll.u32 %s1972_s28, 4  ;;  %s56_s16 = sshll.u32 %s1973_s15, 4  ;;  %s33_s29 = int_to_ptr.vmem [resolvable:$true] %s32_s29  ;;  %s57_s16 = int_to_ptr.vmem [resolvable:$true] %s56_s16 }
  0x32   :  { %s1798_s5 = scalar_lea.vmem %s33_s29, 128  ;;  %p1803_p7 = scmp.lt.s32.totalorder %s33_s29, %s33_s29 }
  0x33   :  { %p1799_p6 = scmp.ne.s32.totalorder %s33_s29, %s1798_s5  ;;  %p1804_p8 = scmp.lt.s32.totalorder %s1798_s5, %s1798_s5 }
  0x35   :  { %p1805_p9 = por %p1804_p8, %p1803_p7 }
  0x37   :  { %p1806_p10 = pnand %p1805_p9, %p1799_p6 }
  0x39   :  { %1809 = shalt.err (!%p1806_p10)
}
  0x3a   :  { %38 = dma.hbm_to_vmem [thread:$0]  %s2245_s0, 128, %s33_s29, [#allocation3], %s1968_s30, %s1968_s30, %s1969_s14  }
  0x3b   :  { %s1818_s7 = scalar_lea.vmem %s57_s16, 1024  ;;  %p1823_p12 = scmp.lt.s32.totalorder %s57_s16, %s57_s16 }
  0x3c   :  { %p1819_p11 = scmp.ne.s32.totalorder %s57_s16, %s1818_s7  ;;  %p1824_p13 = scmp.lt.s32.totalorder %s1818_s7, %s1818_s7 }
  0x3e   :  { %p1825_p0 = por %p1824_p13, %p1823_p12 }
  0x40   :  { %p1826_p1 = pnand %p1825_p0, %p1819_p11 }
  0x42   :  { %1829 = shalt.err (!%p1826_p1)
}
  0x43   :  { %62 = dma.hbm_to_vmem [thread:$0]  %s2247_s2, 1024, %s57_s16, [#allocation6], %s1968_s30, %s1968_s30, %s1969_s14  }
  0x44   :  { %s1974_s21 = smov [#allocation10]   ;;  %s1975_s23 = smov [#allocation13]  }
  0x45   :  { %s80_s22 = sshll.u32 %s1974_s21, 4  ;;  %s104_s1 = sshll.u32 %s1975_s23, 4  ;;  %s81_s22 = int_to_ptr.vmem [resolvable:$true] %s80_s22  ;;  %s105_s1 = int_to_ptr.vmem [resolvable:$true] %s104_s1 }
  0x46   :  { %s1838_s0 = scalar_lea.vmem %s81_s22, 1024  ;;  %p1843_p3 = scmp.lt.s32.totalorder %s81_s22, %s81_s22 }
  0x47   :  { %p1839_p2 = scmp.ne.s32.totalorder %s81_s22, %s1838_s0  ;;  %p1844_p4 = scmp.lt.s32.totalorder %s1838_s0, %s1838_s0 }
  0x49   :  { %p1845_p5 = por %p1844_p4, %p1843_p3 }
  0x4b   :  { %p1846_p6 = pnand %p1845_p5, %p1839_p2 }
  0x4d   :  { %1849 = shalt.err (!%p1846_p6)
}
  0x4e   :  { %86 = dma.hbm_to_vmem [thread:$0]  %s2249_s4, 1024, %s81_s22, [#allocation9], %s1968_s30, %s1968_s30, %s1969_s14  }
  0x4f   :  { %s1858_s2 = scalar_lea.vmem %s105_s1, 1024  ;;  %p1863_p8 = scmp.lt.s32.totalorder %s105_s1, %s105_s1 }
  0x50   :  { %p1859_p7 = scmp.ne.s32.totalorder %s105_s1, %s1858_s2  ;;  %p1864_p9 = scmp.lt.s32.totalorder %s1858_s2, %s1858_s2 }
  0x52   :  { %p1865_p10 = por %p1864_p9, %p1863_p8 }
  0x54   :  { %p1866_p11 = pnand %p1865_p10, %p1859_p7 }
  0x56   :  { %1869 = shalt.err (!%p1866_p11)
}
  0x57   :  { %110 = dma.hbm_to_vmem [thread:$0]  %s2251_s6, 1024, %s105_s1, [#allocation12], %s1968_s30, %s1968_s30, %s1969_s14  }
  0x58   :  { %s1976_s27 = smov [#allocation16]   ;;  %s1977_s29 = smov [#allocation17]  }
  0x59   :  { %s128_s28 = sshll.u32 %s1976_s27, 4  ;;  %s142_s15 = sshll.u32 %s1977_s29, 4  ;;  %s129_s28 = int_to_ptr.vmem [resolvable:$true] %s128_s28  ;;  %s143_s15 = int_to_ptr.vmem [resolvable:$true] %s142_s15 }
  0x5a   :  { %s1878_s4 = scalar_lea.vmem %s129_s28, 1024  ;;  %p1883_p13 = scmp.lt.s32.totalorder %s129_s28, %s129_s28 }
  0x5b   :  { %p1879_p12 = scmp.ne.s32.totalorder %s129_s28, %s1878_s4  ;;  %p1884_p0 = scmp.lt.s32.totalorder %s1878_s4, %s1878_s4 }
  0x5d   :  { %p1885_p1 = por %p1884_p0, %p1883_p13 }
  0x5f   :  { %p1886_p2 = pnand %p1885_p1, %p1879_p12 }
  0x61   :  { %1889 = shalt.err (!%p1886_p2)
}
  0x62   :  { %134 = dma.hbm_to_vmem [thread:$0]  %s2253_s8, 1024, %s129_s28, [#allocation15], %s1968_s30, %s1968_s30, %s1969_s14  }
  0x63   :  { %s1898_s6 = scalar_lea.vmem %s143_s15, 2048  ;;  %p1903_p4 = scmp.lt.s32.totalorder %s143_s15, %s143_s15 }
  0x64   :  { %p1899_p3 = scmp.ne.s32.totalorder %s143_s15, %s1898_s6  ;;  %p1904_p5 = scmp.lt.s32.totalorder %s1898_s6, %s1898_s6 }
  0x66   :  { %p1905_p6 = por %p1904_p5, %p1903_p4 }
  0x68   :  { %p1906_p7 = pnand %p1905_p6, %p1899_p3 }
  0x6a   :  { %1909 = shalt.err (!%p1906_p7)
}
  0x6b   :  { %s1978_s17 = smov 128   ;;  %s1979_s18 = smov 8  }
  0x6c   :  { %148 = dma.hbm_to_vmem [thread:$0]  %s2255_s10, 2048, %s143_s15, [#allocation18], %s1978_s17, %s1978_s17, %s1979_s18  }
  0x6d   :  { %1950 = dma.done.wait [#allocation3], 128  }
  0x6e   :  { %1951 = vsyncadd [#allocation3], 4294967168 }
  0x6f   :  { %1952 = dma.done.wait [#allocation6], 2048  }
  0x70   :  { %1953 = vsyncadd [#allocation6], 4294965248 }
  0x71   :  { %1954 = dma.done.wait [#allocation9], 2048  }
  0x72   :  { %1955 = vsyncadd [#allocation9], 4294965248 }
  0x73   :  { %1956 = dma.done.wait [#allocation12], 2048  }
  0x74   :  { %1957 = vsyncadd [#allocation12], 4294965248 }
  0x75   :  { %1958 = dma.done.wait [#allocation15], 2048  }
  0x76   :  { %1959 = vsyncadd [#allocation15], 4294965248 }
  0x77   :  { %1960 = dma.done.wait [#allocation18], 2048  }
  0x78   :  { %1961 = vsyncadd [#allocation18], 4294965248  ;;  %v1980_v0 = vmov 0.0   ;;  %vm1981_vm0 = vmmov 0   ;;  %v1637_v1 = vld [vmem:[#allocation5 + $0x38] sm:$0xff]   ;;  %v1638_v2 = vld [vmem:[#allocation5 + $0x30] sm:$0xff]  }
  0x79   :  { %1424 = vmatprep.subr.bf16.mxu0 %v1980_v0  ;;  %1440 = vmatprep.mubr.msk.bf16.mxu0 %vm1981_vm0, %v1980_v0  ;;  %v1639_v3 = vld [vmem:[#allocation5 + $0x28] sm:$0xff]   ;;  %v1646_v4 = vld [vmem:[#allocation7 + $0x38] sm:$0xff]   ;;  %v1640_v5 = vld [vmem:[#allocation5 + $0x20] sm:$0xff]   ;;  %s1982_s29 = smov [#allocation19]   ;;  %s1983_s4 = smov [#allocation20]  }
  0x7a   :  { %1444 = vmatprep.subr.bf16.mxu1 %v1980_v0  ;;  %1460 = vmatprep.mubr.msk.bf16.mxu1 %vm1981_vm0, %v1980_v0  ;;  %v1647_v6 = vld [vmem:[#allocation7 + $0x30] sm:$0xff]   ;;  %v1641_v7 = vld [vmem:[#allocation5 + $0x18] sm:$0xff]   ;;  %v1648_v8 = vld [vmem:[#allocation7 + $0x28] sm:$0xff]   ;;  %s1227_s15 = sshll.u32 %s1982_s29, 4  ;;  %s1239_s16 = sshll.u32 %s1983_s4, 4  ;;  %s1228_s15 = int_to_ptr.vmem [resolvable:$true] %s1227_s15  ;;  %s1240_s16 = int_to_ptr.vmem [resolvable:$true] %s1239_s16 }
  0x7b   :  { %1425 = vmatpush3.bf16.msra.mxu0 %v1637_v1  ;;  %1445 = vmatpush3.bf16.msra.mxu1 %v1646_v4  ;;  %v1642_v9 = vld [vmem:[#allocation5 + $0x10] sm:$0xff]   ;;  %v1649_v10 = vld [vmem:[#allocation7 + $0x20] sm:$0xff]   ;;  %v1643_v11 = vld [vmem:[#allocation5 + $0x8] sm:$0xff]   ;;  %s1910_s5 = scalar_lea.vmem %s1228_s15, 256  ;;  %p1915_p9 = scmp.lt.s32.totalorder %s1228_s15, %s1228_s15 }
  0x7c   :  { %1426 = vmatprep.subr.bf16.mxu0 %v1980_v0  ;;  %1446 = vmatprep.subr.bf16.mxu1 %v1980_v0  ;;  %v1650_v12 = vld [vmem:[#allocation7 + $0x18] sm:$0xff]   ;;  %v1644_v13 = vld [vmem:[#allocation5] sm:$0xff]   ;;  %v1651_v15 = vld [vmem:[#allocation7 + $0x10] sm:$0xff]   ;;  %p1911_p8 = scmp.ne.s32.totalorder %s1228_s15, %s1910_s5  ;;  %p1916_p10 = scmp.lt.s32.totalorder %s1910_s5, %s1910_s5 }
  0x7d   :  { %v1645_v14 = vld [vmem:[#allocation2] sm:$0xff]   ;;  %v1652_v16 = vld [vmem:[#allocation7 + $0x8] sm:$0xff]   ;;  %v1653_v17 = vld [vmem:[#allocation7] sm:$0xff]  }
  0x7e   :  { %v1654_v18 = vld [vmem:[#allocation8 + $0x38] sm:$0xff]   ;;  %v1655_v19 = vld [vmem:[#allocation8 + $0x30] sm:$0xff]   ;;  %v1656_v20 = vld [vmem:[#allocation8 + $0x28] sm:$0xff]   ;;  %p1917_p11 = por %p1916_p10, %p1915_p9 }
  0x7f   :  { %1427 = vmatpush3.bf16.msra.mxu0 %v1638_v2  ;;  %1447 = vmatpush3.bf16.msra.mxu1 %v1647_v6  ;;  %v1657_v21 = vld [vmem:[#allocation8 + $0x20] sm:$0xff]   ;;  %v1658_v22 = vld [vmem:[#allocation8 + $0x18] sm:$0xff]   ;;  %v1659_v33 = vld [vmem:[#allocation8 + $0x10] sm:$0xff]  }
  0x80   :  { %1428 = vmatprep.subr.bf16.mxu0 %v1980_v0  ;;  %1448 = vmatprep.subr.bf16.mxu1 %v1980_v0  ;;  %v1260_v23 = vld [vmem:[%s2254_s9] ss:$0 sm:$0xff]  ;;  %v1660_v34 = vld [vmem:[#allocation8 + $0x8] sm:$0xff]   ;;  %v1661_v35 = vld [vmem:[#allocation8] sm:$0xff]   ;;  %p1918_p12 = pnand %p1917_p11, %p1911_p8 }
  0x81   :  { %v1662_v36 = vld [vmem:[#allocation10 + $0x38] sm:$0xff]   ;;  %v1663_v37 = vld [vmem:[#allocation10 + $0x30] sm:$0xff]   ;;  %v1664_v38 = vld [vmem:[#allocation10 + $0x28] sm:$0xff]  }
  0x82   :  { %v1665_v39 = vld [vmem:[#allocation10 + $0x20] sm:$0xff]   ;;  %v1666_v40 = vld [vmem:[#allocation10 + $0x18] sm:$0xff]   ;;  %v1667_v51 = vld [vmem:[#allocation10 + $0x10] sm:$0xff]  }
  0x83   :  { %1429 = vmatpush3.bf16.msra.mxu0 %v1639_v3  ;;  %1449 = vmatpush3.bf16.msra.mxu1 %v1648_v8  ;;  %v1270_v41 = vld [vmem:[%s2254_s9 + $0x1] ss:$0 sm:$0xff]  ;;  %v1668_v52 = vld [vmem:[#allocation10 + $0x8] sm:$0xff]   ;;  %v1669_v53 = vld [vmem:[#allocation10] sm:$0xff]  }
  0x84   :  { %1430 = vmatprep.subr.bf16.mxu0 %v1980_v0  ;;  %1450 = vmatprep.subr.bf16.mxu1 %v1980_v0  ;;  %v1670_v54 = vld [vmem:[#allocation11 + $0x38] sm:$0xff]   ;;  %v1671_v55 = vld [vmem:[#allocation11 + $0x30] sm:$0xff]   ;;  %v1672_v56 = vld [vmem:[#allocation11 + $0x28] sm:$0xff]  }
  0x85   :  { %v1673_v57 = vld [vmem:[#allocation11 + $0x20] sm:$0xff]   ;;  %v1674_v58 = vld [vmem:[#allocation11 + $0x18] sm:$0xff]   ;;  %v1675_v59 = vld [vmem:[#allocation11 + $0x10] sm:$0xff]  }
  0x86   :  { %v1279_v60 = vld [vmem:[%s2254_s9 + $0x2] ss:$0 sm:$0xff]  ;;  %v1677_v8 = vld [vmem:[#allocation11] sm:$0xff]  }
  0x87   :  { %1431 = vmatpush3.bf16.msra.mxu0 %v1640_v5  ;;  %1451 = vmatpush3.bf16.msra.mxu1 %v1649_v10 }
  0x88   :  { %1432 = vmatprep.subr.bf16.mxu0 %v1980_v0  ;;  %1452 = vmatprep.subr.bf16.mxu1 %v1980_v0 }
  0x8b   :  { %1433 = vmatpush3.bf16.msra.mxu0 %v1641_v7  ;;  %1453 = vmatpush3.bf16.msra.mxu1 %v1650_v12  ;;  %v1676_v7 = vld [vmem:[#allocation11 + $0x8] sm:$0xff]  }
  0x8c   :  { %1434 = vmatprep.subr.bf16.mxu0 %v1980_v0  ;;  %1454 = vmatprep.subr.bf16.mxu1 %v1980_v0 }
  0x8f   :  { %1435 = vmatpush3.bf16.msra.mxu0 %v1642_v9  ;;  %1455 = vmatpush3.bf16.msra.mxu1 %v1651_v15  ;;  %v1288_v9 = vld [vmem:[%s2254_s9 + $0x3] ss:$0 sm:$0xff] }
  0x90   :  { %1436 = vmatprep.subr.bf16.mxu0 %v1980_v0  ;;  %1456 = vmatprep.subr.bf16.mxu1 %v1980_v0 }
  0x93   :  { %1437 = vmatpush3.bf16.msra.mxu0 %v1643_v11  ;;  %1457 = vmatpush3.bf16.msra.mxu1 %v1652_v16 }
  0x94   :  { %1438 = vmatprep.subr.bf16.mxu0 %v1980_v0  ;;  %1458 = vmatprep.subr.bf16.mxu1 %v1980_v0 }
  0x97   :  { %1439 = vmatpush3.bf16.msra.mxu0 %v1644_v13  ;;  %1459 = vmatpush3.bf16.msra.mxu1 %v1653_v17 }
  0x98   :  { %1464 = vmatprep.subr.bf16.mxu0 %v1980_v0  ;;  %1484 = vmatprep.subr.bf16.mxu1 %v1980_v0 }
  0x9a   :  { %1441 = vmatmul.mubr.bf16.vlgmr.msra.gmra.mxu0 %v1645_v14 }
  0x9b   :  { %1480 = vmatprep.mubr.msk.bf16.mxu0 %vm1981_vm0, %v1980_v0  ;;  %1465 = vmatpush3.bf16.msra.mxu0 %v1654_v18 }
  0x9c   :  { %1466 = vmatprep.subr.bf16.mxu0 %v1980_v0 }
  0x9f   :  { %1467 = vmatpush3.bf16.msra.mxu0 %v1655_v19  ;;  %v1678_v19 = vld [vmem:[#allocation13 + $0x38] sm:$0xff]  }
  0xa0   :  { %1468 = vmatprep.subr.bf16.mxu0 %v1980_v0 }
  0xa3   :  { %1469 = vmatpush3.bf16.msra.mxu0 %v1656_v20  ;;  %v1679_v20 = vld [vmem:[#allocation13 + $0x30] sm:$0xff]  }
  0xa4   :  { %1470 = vmatprep.subr.bf16.mxu0 %v1980_v0 }
  0xa7   :  { %1471 = vmatpush3.bf16.msra.mxu0 %v1657_v21  ;;  %v1680_v21 = vld [vmem:[#allocation13 + $0x28] sm:$0xff]  }
  0xa8   :  { %1472 = vmatprep.subr.bf16.mxu0 %v1980_v0 }
  0xab   :  { %1473 = vmatpush3.bf16.msra.mxu0 %v1658_v22  ;;  %v1681_v22 = vld [vmem:[#allocation13 + $0x20] sm:$0xff]  }
  0xac   :  { %1474 = vmatprep.subr.bf16.mxu0 %v1980_v0 }
  0xaf   :  { %1475 = vmatpush3.bf16.msra.mxu0 %v1659_v33  ;;  %v1297_v33 = vld [vmem:[%s2254_s9 + $0x4] ss:$0 sm:$0xff] }
  0xb0   :  { %1476 = vmatprep.subr.bf16.mxu0 %v1980_v0 }
  0xb3   :  { %1477 = vmatpush3.bf16.msra.mxu0 %v1660_v34 }
  0xb4   :  { %1478 = vmatprep.subr.bf16.mxu0 %v1980_v0 }
  0xb7   :  { %1479 = vmatpush3.bf16.msra.mxu0 %v1661_v35 }
  0xb8   :  { %1504 = vmatprep.subr.bf16.mxu0 %v1980_v0 }
 0x15a   :  { %v293_v24 = vpop.f32.mrf.mxu0 }
 0x15b   :  { %v294_v26 = vadd.f32 %v1260_v23, %v293_v24  ;;  %v1683_v24 = vld [vmem:[#allocation13 + $0x10] sm:$0xff]  }
 0x15c   :  { %v1442_v25 = vpop.f32.mrf.mxu0 }
 0x15d   :  { %v300_v30 = vmax.f32 %v294_v26, 0.0  ;;  %v1684_v25 = vld [vmem:[#allocation13 + $0x8] sm:$0xff]   ;;  %v1685_v26 = vld [vmem:[#allocation13] sm:$0xff]  }
 0x15e   :  { %v296_v27 = vpop.f32.mrf.mxu0 }
 0x15f   :  { %v297_v28 = vadd.f32 %v1260_v23, %v296_v27  ;;  %v1682_v23 = vld [vmem:[#allocation13 + $0x18] sm:$0xff]  }
 0x160   :  { %v1443_v29 = vpop.f32.mrf.mxu0  ;;  %v1686_v27 = vld [vmem:[#allocation14 + $0x38] sm:$0xff]  }
 0x161   :  { %v301_v31 = vmax.f32 %v297_v28, 0.0  ;;  %v1687_v28 = vld [vmem:[#allocation14 + $0x30] sm:$0xff]   ;;  %v1688_v29 = vld [vmem:[#allocation14 + $0x28] sm:$0xff]  }
 0x163   :  { %v302_v32 = vpack.c.bf16 %v301_v31, %v300_v30  ;;  %v1689_v30 = vld [vmem:[#allocation14 + $0x20] sm:$0xff]   ;;  %v1690_v31 = vld [vmem:[#allocation14 + $0x18] sm:$0xff]  }
 0x165   :  { %1461 = vmatmul.mubr.bf16.vlgmr.msra.gmra.mxu1 %v302_v32  ;;  %v1691_v32 = vld [vmem:[#allocation14 + $0x10] sm:$0xff]  }
 0x166   :  { %1500 = vmatprep.mubr.msk.bf16.mxu1 %vm1981_vm0, %v1980_v0  ;;  %1485 = vmatpush3.bf16.msra.mxu1 %v1662_v36 }
 0x167   :  { %1486 = vmatprep.subr.bf16.mxu1 %v1980_v0 }
 0x16a   :  { %1487 = vmatpush3.bf16.msra.mxu1 %v1663_v37 }
 0x16b   :  { %1488 = vmatprep.subr.bf16.mxu1 %v1980_v0 }
 0x16e   :  { %1489 = vmatpush3.bf16.msra.mxu1 %v1664_v38 }
 0x16f   :  { %1490 = vmatprep.subr.bf16.mxu1 %v1980_v0 }
 0x172   :  { %1491 = vmatpush3.bf16.msra.mxu1 %v1665_v39 }
 0x173   :  { %1492 = vmatprep.subr.bf16.mxu1 %v1980_v0 }
 0x176   :  { %1493 = vmatpush3.bf16.msra.mxu1 %v1666_v40 }
 0x177   :  { %1494 = vmatprep.subr.bf16.mxu1 %v1980_v0 }
 0x17a   :  { %1495 = vmatpush3.bf16.msra.mxu1 %v1667_v51  ;;  %v1306_v51 = vld [vmem:[%s2254_s9 + $0x5] ss:$0 sm:$0xff] }
 0x17b   :  { %1496 = vmatprep.subr.bf16.mxu1 %v1980_v0 }
 0x17e   :  { %1497 = vmatpush3.bf16.msra.mxu1 %v1668_v52 }
 0x17f   :  { %1498 = vmatprep.subr.bf16.mxu1 %v1980_v0 }
 0x182   :  { %1499 = vmatpush3.bf16.msra.mxu1 %v1669_v53 }
 0x183   :  { %1524 = vmatprep.subr.bf16.mxu1 %v1980_v0 }
 0x225   :  { %v406_v42 = vpop.f32.mrf.mxu1 }
 0x226   :  { %v407_v44 = vadd.f32 %v1270_v41, %v406_v42 }
 0x227   :  { %v1462_v43 = vpop.f32.mrf.mxu1 }
 0x228   :  { %v413_v48 = vmax.f32 %v407_v44, 0.0  ;;  %v1692_v43 = vld [vmem:[#allocation14 + $0x8] sm:$0xff]   ;;  %v1693_v44 = vld [vmem:[#allocation14] sm:$0xff]  }
 0x229   :  { %v409_v45 = vpop.f32.mrf.mxu1 }
 0x22a   :  { %v410_v46 = vadd.f32 %v1270_v41, %v409_v45  ;;  %v1106_v45 = vld [vmem:[#allocation17 + $0x78] sm:$0xff] }
 0x22b   :  { %v1463_v47 = vpop.f32.mrf.mxu1 }
 0x22c   :  { %v414_v49 = vmax.f32 %v410_v46, 0.0  ;;  %v1694_v46 = vld [vmem:[#allocation16 + $0x38] sm:$0xff]   ;;  %v1695_v47 = vld [vmem:[#allocation16 + $0x30] sm:$0xff]  }
 0x22e   :  { %v415_v50 = vpack.c.bf16 %v414_v49, %v413_v48  ;;  %v1696_v48 = vld [vmem:[#allocation16 + $0x28] sm:$0xff]   ;;  %v1697_v49 = vld [vmem:[#allocation16 + $0x20] sm:$0xff]  }
 0x230   :  { %1481 = vmatmul.mubr.bf16.vlgmr.msra.gmra.mxu0 %v415_v50  ;;  %v1698_v50 = vld [vmem:[#allocation16 + $0x18] sm:$0xff]  }
 0x231   :  { %1520 = vmatprep.mubr.msk.bf16.mxu0 %vm1981_vm0, %v1980_v0  ;;  %1505 = vmatpush3.bf16.msra.mxu0 %v1670_v54 }
 0x232   :  { %1506 = vmatprep.subr.bf16.mxu0 %v1980_v0 }
 0x235   :  { %1507 = vmatpush3.bf16.msra.mxu0 %v1671_v55 }
 0x236   :  { %1508 = vmatprep.subr.bf16.mxu0 %v1980_v0 }
 0x239   :  { %1509 = vmatpush3.bf16.msra.mxu0 %v1672_v56 }
 0x23a   :  { %1510 = vmatprep.subr.bf16.mxu0 %v1980_v0 }
 0x23d   :  { %1511 = vmatpush3.bf16.msra.mxu0 %v1673_v57 }
 0x23e   :  { %1512 = vmatprep.subr.bf16.mxu0 %v1980_v0 }
 0x241   :  { %1513 = vmatpush3.bf16.msra.mxu0 %v1674_v58 }
 0x242   :  { %1514 = vmatprep.subr.bf16.mxu0 %v1980_v0 }
 0x245   :  { %1515 = vmatpush3.bf16.msra.mxu0 %v1675_v59 }
 0x246   :  { %1516 = vmatprep.subr.bf16.mxu0 %v1980_v0 }
 0x249   :  { %1517 = vmatpush3.bf16.msra.mxu0 %v1676_v7  ;;  %v1096_v7 = vld [vmem:[#allocation17 + $0x28] sm:$0xff] }
 0x24a   :  { %1518 = vmatprep.subr.bf16.mxu0 %v1980_v0 }
 0x24d   :  { %1519 = vmatpush3.bf16.msra.mxu0 %v1677_v8  ;;  %v1095_v8 = vld [vmem:[#allocation17 + $0x20] sm:$0xff] }
 0x24e   :  { %1544 = vmatprep.subr.bf16.mxu0 %v1980_v0 }
 0x2f0   :  { %v519_v61 = vpop.f32.mrf.mxu0 }
 0x2f1   :  { %v520_v63 = vadd.f32 %v1279_v60, %v519_v61  ;;  %v1105_v61 = vld [vmem:[#allocation17 + $0x70] sm:$0xff] }
 0x2f2   :  { %v1482_v62 = vpop.f32.mrf.mxu0 }
 0x2f3   :  { %v526_v4 = vmax.f32 %v520_v63, 0.0  ;;  %v1104_v62 = vld [vmem:[#allocation17 + $0x68] sm:$0xff]  ;;  %v1103_v63 = vld [vmem:[#allocation17 + $0x60] sm:$0xff] }
 0x2f4   :  { %v522_v1 = vpop.f32.mrf.mxu0 }
 0x2f5   :  { %v523_v2 = vadd.f32 %v1279_v60, %v522_v1  ;;  %v1102_v1 = vld [vmem:[#allocation17 + $0x58] sm:$0xff] }
 0x2f6   :  { %v1483_v3 = vpop.f32.mrf.mxu0 }
 0x2f7   :  { %v527_v5 = vmax.f32 %v523_v2, 0.0  ;;  %v1101_v2 = vld [vmem:[#allocation17 + $0x50] sm:$0xff]  ;;  %v1100_v3 = vld [vmem:[#allocation17 + $0x48] sm:$0xff] }
 0x2f9   :  { %v528_v6 = vpack.c.bf16 %v527_v5, %v526_v4  ;;  %v1099_v4 = vld [vmem:[#allocation17 + $0x40] sm:$0xff]  ;;  %v1098_v5 = vld [vmem:[#allocation17 + $0x38] sm:$0xff] }
 0x2fb   :  { %1501 = vmatmul.mubr.bf16.vlgmr.msra.gmra.mxu1 %v528_v6  ;;  %v1097_v6 = vld [vmem:[#allocation17 + $0x30] sm:$0xff] }
 0x2fc   :  { %1540 = vmatprep.mubr.msk.bf16.mxu1 %vm1981_vm0, %v1980_v0  ;;  %1525 = vmatpush3.bf16.msra.mxu1 %v1678_v19 }
 0x2fd   :  { %1526 = vmatprep.subr.bf16.mxu1 %v1980_v0 }
 0x300   :  { %1527 = vmatpush3.bf16.msra.mxu1 %v1679_v20 }
 0x301   :  { %1528 = vmatprep.subr.bf16.mxu1 %v1980_v0 }
 0x304   :  { %1529 = vmatpush3.bf16.msra.mxu1 %v1680_v21 }
 0x305   :  { %1530 = vmatprep.subr.bf16.mxu1 %v1980_v0 }
 0x308   :  { %1531 = vmatpush3.bf16.msra.mxu1 %v1681_v22 }
 0x309   :  { %1532 = vmatprep.subr.bf16.mxu1 %v1980_v0 }
 0x30c   :  { %1533 = vmatpush3.bf16.msra.mxu1 %v1682_v23 }
 0x30d   :  { %1534 = vmatprep.subr.bf16.mxu1 %v1980_v0 }
 0x310   :  { %1535 = vmatpush3.bf16.msra.mxu1 %v1683_v24 }
 0x311   :  { %1536 = vmatprep.subr.bf16.mxu1 %v1980_v0 }
 0x314   :  { %1537 = vmatpush3.bf16.msra.mxu1 %v1684_v25 }
 0x315   :  { %1538 = vmatprep.subr.bf16.mxu1 %v1980_v0 }
 0x318   :  { %1539 = vmatpush3.bf16.msra.mxu1 %v1685_v26 }
 0x319   :  { %1564 = vmatprep.subr.bf16.mxu1 %v1980_v0 }
 0x3bb   :  { %v632_v10 = vpop.f32.mrf.mxu1 }
 0x3bc   :  { %v2180_v11 = vadd.f32 %v1288_v9, %v632_v10  ;;  %v1093_v10 = vld [vmem:[#allocation17 + $0x10] sm:$0xff] }
 0x3bd   :  { %v1502_v12 = vpop.f32.mrf.mxu1 }
 0x3be   :  { %v1107_v13 = vmul.f32 %v2180_v11, %v2180_v11  ;;  %v1091_v12 = vld [vmem:[#allocation17] sm:$0xff] }
 0x3bf   :  { %v635_v14 = vpop.f32.mrf.mxu1 }
 0x3c0   :  { %v2184_v15 = vadd.f32 %v1288_v9, %v635_v14  ;;  %1109 = vadd.xlane.f32.xlu0 %v1107_v13  ;;  %v1094_v9 = vld [vmem:[#allocation17 + $0x18] sm:$0xff]  ;;  %v1699_v13 = vld [vmem:[#allocation16 + $0x10] sm:$0xff]   ;;  %v1700_v14 = vld [vmem:[#allocation16 + $0x8] sm:$0xff]  }
 0x3c1   :  { %v1503_v16 = vpop.f32.mrf.mxu1 }
 0x3c2   :  { %v639_v17 = vpack.c.bf16 %v2184_v15, %v2180_v11  ;;  %v1108_v18 = vmul.f32 %v2184_v15, %v2184_v15  ;;  %v1701_v16 = vld [vmem:[#allocation16] sm:$0xff]  }
 0x3c4   :  { %1111 = vadd.xlane.f32.xlu0 %v1108_v18  ;;  %1521 = vmatmul.mubr.bf16.vlgmr.msra.gmra.mxu0 %v639_v17  ;;  %v1315_v17 = vld [vmem:[%s2254_s9 + $0x6] ss:$0 sm:$0xff] }
 0x3c5   :  { %1560 = vmatprep.mubr.msk.bf16.mxu0 %vm1981_vm0, %v1980_v0  ;;  %1545 = vmatpush3.bf16.msra.mxu0 %v1686_v27 }
 0x3c6   :  { %1546 = vmatprep.subr.bf16.mxu0 %v1980_v0 }
 0x3c9   :  { %1547 = vmatpush3.bf16.msra.mxu0 %v1687_v28 }
 0x3ca   :  { %1548 = vmatprep.subr.bf16.mxu0 %v1980_v0 }
 0x3cd   :  { %1549 = vmatpush3.bf16.msra.mxu0 %v1688_v29 }
 0x3ce   :  { %1550 = vmatprep.subr.bf16.mxu0 %v1980_v0 }
 0x3d1   :  { %1551 = vmatpush3.bf16.msra.mxu0 %v1689_v30 }
 0x3d2   :  { %1552 = vmatprep.subr.bf16.mxu0 %v1980_v0 }
 0x3d5   :  { %1553 = vmatpush3.bf16.msra.mxu0 %v1690_v31 }
 0x3d6   :  { %1554 = vmatprep.subr.bf16.mxu0 %v1980_v0 }
 0x3d9   :  { %1555 = vmatpush3.bf16.msra.mxu0 %v1691_v32 }
 0x3da   :  { %1556 = vmatprep.subr.bf16.mxu0 %v1980_v0 }
 0x3dd   :  { %1557 = vmatpush3.bf16.msra.mxu0 %v1692_v43 }
 0x3de   :  { %1558 = vmatprep.subr.bf16.mxu0 %v1980_v0 }
 0x3e1   :  { %1559 = vmatpush3.bf16.msra.mxu0 %v1693_v44 }
 0x3e2   :  { %1584 = vmatprep.subr.mxu0 %v1106_v45 }
 0x449   :  { %v1110_v26 = vpop.xlane.xlu0 %1109 }
 0x44d   :  { %v1112_v27 = vpop.xlane.xlu0 %1111 }
 0x484   :  { %v743_v34 = vpop.f32.mrf.mxu0 }
 0x485   :  { %v744_v36 = vadd.f32 %v1297_v33, %v743_v34 }
 0x486   :  { %v1522_v35 = vpop.f32.mrf.mxu0 }
 0x487   :  { %v750_v40 = vmax.f32 %v744_v36, 0.0 }
 0x488   :  { %v746_v37 = vpop.f32.mrf.mxu0 }
 0x489   :  { %v747_v38 = vadd.f32 %v1297_v33, %v746_v37 }
 0x48a   :  { %v1523_v39 = vpop.f32.mrf.mxu0 }
 0x48b   :  { %v751_v41 = vmax.f32 %v747_v38, 0.0 }
 0x48d   :  { %v752_v42 = vpack.c.bf16 %v751_v41, %v750_v40  ;;  %v1207_v40 = vlaneseq }
 0x48f   :  { %1541 = vmatmul.mubr.bf16.vlgmr.msra.gmra.mxu1 %v752_v42  ;;  %v1208_v41 = vand.u32 127, %v1207_v40 }
 0x490   :  { %1580 = vmatprep.mubr.msk.bf16.mxu1 %vm1981_vm0, %v1980_v0  ;;  %1565 = vmatpush3.bf16.msra.mxu1 %v1694_v46 }
 0x491   :  { %1566 = vmatprep.subr.bf16.mxu1 %v1980_v0  ;;  %vm1209_vm1 = vcmp.lt.s32.totalorder %v1208_v41, 8 }
 0x494   :  { %1567 = vmatpush3.bf16.msra.mxu1 %v1695_v47 }
 0x495   :  { %1568 = vmatprep.subr.bf16.mxu1 %v1980_v0 }
 0x498   :  { %1569 = vmatpush3.bf16.msra.mxu1 %v1696_v48  ;;  %v1324_v48 = vld [vmem:[%s2254_s9 + $0x7] ss:$0 sm:$0xff] }
 0x499   :  { %1570 = vmatprep.subr.bf16.mxu1 %v1980_v0 }
 0x49c   :  { %1571 = vmatpush3.bf16.msra.mxu1 %v1697_v49 }
 0x49d   :  { %1572 = vmatprep.subr.bf16.mxu1 %v1980_v0 }
 0x4a0   :  { %1573 = vmatpush3.bf16.msra.mxu1 %v1698_v50 }
 0x4a1   :  { %1574 = vmatprep.subr.bf16.mxu1 %v1980_v0 }
 0x4a4   :  { %1575 = vmatpush3.bf16.msra.mxu1 %v1699_v13 }
 0x4a5   :  { %1576 = vmatprep.subr.bf16.mxu1 %v1980_v0 }
 0x4a8   :  { %1577 = vmatpush3.bf16.msra.mxu1 %v1700_v14 }
 0x4a9   :  { %1578 = vmatprep.subr.bf16.mxu1 %v1980_v0  ;;  %v1333_v0 = vld [vmem:[%s2256_s11] ss:$0 sm:$0xff] }
 0x4aa   :  { %v1196_v29 = vadd.f32 %v1333_v0, %v1112_v27  ;;  %v1195_v32 = vadd.f32 %v1333_v0, %v1110_v26 }
 0x4ac   :  { %1579 = vmatpush3.bf16.msra.mxu1 %v1701_v16 }
 0x54f   :  { %v856_v52 = vpop.f32.mrf.mxu1 }
 0x550   :  { %v857_v54 = vadd.f32 %v1306_v51, %v856_v52 }
 0x551   :  { %v1542_v53 = vpop.f32.mrf.mxu1 }
 0x552   :  { %v863_v58 = vmax.f32 %v857_v54, 0.0 }
 0x553   :  { %v859_v55 = vpop.f32.mrf.mxu1 }
 0x554   :  { %v860_v56 = vadd.f32 %v1306_v51, %v859_v55 }
 0x555   :  { %v1543_v57 = vpop.f32.mrf.mxu1 }
 0x556   :  { %v864_v59 = vmax.f32 %v860_v56, 0.0 }
 0x558   :  { %v865_v60 = vpack.c.bf16 %v864_v59, %v863_v58 }
 0x55a   :  { %1561 = vmatmul.mubr.bf16.vlgmr.msra.gmra.mxu0 %v865_v60 }
 0x55b   :  { %1585 = vmatpush3.msra.mxu0 %v1106_v45  ;;  %1616 = vmatprep.mubr.f32.mxu0 %v2180_v11  ;;  %v1092_v11 = vld [vmem:[#allocation17 + $0x8] sm:$0xff] }
 0x55c   :  { %1586 = vmatprep.subr.mxu0 %v1105_v61 }
 0x55d   :  { %1587 = vmatpush3.msra.mxu0 %v1105_v61 }
 0x55e   :  { %1588 = vmatprep.subr.mxu0 %v1104_v62 }
 0x55f   :  { %1589 = vmatpush3.msra.mxu0 %v1104_v62 }
 0x560   :  { %1590 = vmatprep.subr.mxu0 %v1103_v63 }
 0x561   :  { %1591 = vmatpush3.msra.mxu0 %v1103_v63 }
 0x562   :  { %1592 = vmatprep.subr.mxu0 %v1102_v1 }
 0x563   :  { %1593 = vmatpush3.msra.mxu0 %v1102_v1 }
 0x564   :  { %1594 = vmatprep.subr.mxu0 %v1101_v2 }
 0x565   :  { %1595 = vmatpush3.msra.mxu0 %v1101_v2 }
 0x566   :  { %1596 = vmatprep.subr.mxu0 %v1100_v3 }
 0x567   :  { %1597 = vmatpush3.msra.mxu0 %v1100_v3 }
 0x568   :  { %1598 = vmatprep.subr.mxu0 %v1099_v4 }
 0x569   :  { %1599 = vmatpush3.msra.mxu0 %v1099_v4 }
 0x56a   :  { %1600 = vmatprep.subr.mxu0 %v1098_v5 }
 0x56b   :  { %1601 = vmatpush3.msra.mxu0 %v1098_v5 }
 0x56c   :  { %1602 = vmatprep.subr.mxu0 %v1097_v6 }
 0x56d   :  { %1603 = vmatpush3.msra.mxu0 %v1097_v6 }
 0x56e   :  { %1604 = vmatprep.subr.mxu0 %v1096_v7 }
 0x56f   :  { %1605 = vmatpush3.msra.mxu0 %v1096_v7 }
 0x570   :  { %1606 = vmatprep.subr.mxu0 %v1095_v8 }
 0x571   :  { %1607 = vmatpush3.msra.mxu0 %v1095_v8 }
 0x572   :  { %1608 = vmatprep.subr.mxu0 %v1094_v9 }
 0x573   :  { %1609 = vmatpush3.msra.mxu0 %v1094_v9 }
 0x574   :  { %1610 = vmatprep.subr.mxu0 %v1093_v10 }
 0x575   :  { %1611 = vmatpush3.msra.mxu0 %v1093_v10 }
 0x576   :  { %1612 = vmatprep.subr.mxu0 %v1092_v11 }
 0x577   :  { %1613 = vmatpush3.msra.mxu0 %v1092_v11 }
 0x578   :  { %1614 = vmatprep.subr.mxu0 %v1091_v12 }
 0x579   :  { %1615 = vmatpush3.msra.mxu0 %v1091_v12 }
 0x57a   :  { %1617 = vmatmul.mubr.f32.vlgmr.msra.gmra.mxu0 %v2184_v15 }
 0x61a   :  { %v969_v18 = vpop.f32.mrf.mxu0 }
 0x61b   :  { %v970_v20 = vadd.f32 %v1315_v17, %v969_v18 }
 0x61c   :  { %v1562_v19 = vpop.f32.mrf.mxu0 }
 0x61d   :  { %v976_v23 = vmax.f32 %v970_v20, 0.0 }
 0x61e   :  { %v972_v21 = vpop.f32.mrf.mxu0 }
 0x61f   :  { %v973_v22 = vadd.f32 %v1315_v17, %v972_v21 }
 0x620   :  { %v1563_v15 = vpop.f32.mrf.mxu0 }
 0x621   :  { %v977_v24 = vmax.f32 %v973_v22, 0.0 }
 0x623   :  { %v978_v25 = vpack.c.bf16 %v977_v24, %v976_v23 }
 0x625   :  { %1581 = vmatmul.mubr.bf16.vlgmr.msra.gmra.mxu1 %v978_v25 }
 0x63a   :  { %v1618_v28 = vpop.f32.mrf.mxu0 }
 0x63b   :  { %v1198_v30 = vmul.f32 2.0, %v1618_v28 }
 0x63c   :  { %v1179_v31 = vpop.f32.mrf.mxu0 }
 0x63d   :  { %v1200_v33 = vsub.f32 %v1196_v29, %v1198_v30  ;;  %v1197_v34 = vmul.f32 2.0, %v1179_v31 }
 0x63f   :  { %v1202_v35 = vmax.f32 %v1200_v33, 0.0  ;;  %v1199_v36 = vsub.f32 %v1195_v32, %v1197_v34 }
 0x641   :  { %v1201_v37 = vmax.f32 %v1199_v36, 0.0  ;;  %v1204_v38 = vadd.f32 1.0, %v1202_v35 }
 0x643   :  { %v1203_v39 = vadd.f32 1.0, %v1201_v37 }
 0x645   :  { %1702 = vrcp.f32 %v1203_v39 }
 0x646   :  { %1704 = vrcp.f32 %v1204_v38 }
 0x652   :  { %v1703_v42 = vpop.eup %1702 }
 0x653   :  { %v1210_v43 = vsel %vm1209_vm1, %v1703_v42, 0.0  ;;  %v1705_v44 = vpop.eup %1704 }
 0x654   :  { %1212 = vadd.xlane.f32.xlu1 %v1210_v43  ;;  %v1211_v45 = vsel %vm1209_vm1, %v1705_v44, 0.0 }
 0x658   :  { %1214 = vadd.xlane.f32.xlu1 %v1211_v45 }
 0x6dd   :  { %v1213_v46 = vpop.xlane.xlu1 %1212 }
 0x6de   :  { %1706 = vrcp.f32 %v1213_v46 }
 0x6e1   :  { %v1215_v47 = vpop.xlane.xlu1 %1214 }
 0x6e2   :  { %1708 = vrcp.f32 %v1215_v47 }
 0x6e5   :  { %v1082_v49 = vpop.f32.mrf.mxu1 }
 0x6e6   :  { %v1083_v50 = vadd.f32 %v1324_v48, %v1082_v49 }
 0x6e7   :  { %v1582_v51 = vpop.f32.mrf.mxu1 }
 0x6e8   :  { %1089 = vst [vmem:[#allocation19] sm:$0xff] %v1083_v50 }
 0x6e9   :  { %v1085_v52 = vpop.f32.mrf.mxu1 }
 0x6ea   :  { %v1086_v53 = vadd.f32 %v1324_v48, %v1085_v52 }
 0x6eb   :  { %v1707_v54 = vpop.eup %1706  ;;  %v1583_v55 = vpop.f32.mrf.mxu1 }
 0x6ec   :  { %1090 = vst [vmem:[#allocation19 + $0x8] sm:$0xff] %v1086_v53  ;;  %v1217_v56 = vmul.f32 %v1707_v54, %v1210_v43 }
 0x6ed   :  { %1921 = shalt.err (!%p1918_p12)
}
 0x6ee   :  { %1233 = dma.vmem_to_hbm [thread:$0]  %s1228_s15, 256, %s2257_s12, [#allocation4], %s1978_s17, %s1978_s17, %s1979_s18   ;;  %1220 = vst [vmem:[#allocation20] sm:$0xff] %v1217_v56 }
 0x6ef   :  { %v1709_v57 = vpop.eup %1708  ;;  %s1930_s7 = scalar_lea.vmem %s1240_s16, 256  ;;  %p1935_p0 = scmp.lt.s32.totalorder %s1240_s16, %s1240_s16 }
 0x6f0   :  { %v1219_v58 = vmul.f32 %v1709_v57, %v1211_v45  ;;  %p1931_p13 = scmp.ne.s32.totalorder %s1240_s16, %s1930_s7  ;;  %p1936_p1 = scmp.lt.s32.totalorder %s1930_s7, %s1930_s7 }
 0x6f2   :  { %1221 = vst [vmem:[#allocation20 + $0x8] sm:$0xff] %v1219_v58  ;;  %p1937_p2 = por %p1936_p1, %p1935_p0 }
 0x6f4   :  { %p1938_p3 = pnand %p1937_p2, %p1931_p13 }
 0x6f6   :  { %1941 = shalt.err (!%p1938_p3)
}
 0x6f7   :  { %1245 = dma.vmem_to_hbm [thread:$0]  %s1240_s16, 256, %s2258_s13, [#allocation21], %s1978_s17, %s1978_s17, %s1979_s18  }
 0x6f8   :  { %1962 = dma.done.wait [#allocation4], 256  }
 0x6f9   :  { %1963 = vsyncadd [#allocation4], 4294967040 }
 0x6fa   :  { %1964 = dma.done.wait [#allocation21], 256  }
 0x6fb   :  { %1965 = vsyncadd [#allocation21], 4294967040 }
 0x6fc   :  { %1252 = vsyncpa [#allocation3], 1 }
 0x6fd   :  { %1253 = vsyncpa [#allocation6], 1 }
 0x6fe   :  { %1254 = vsyncpa [#allocation9], 1 }
 0x6ff   :  { %1255 = vsyncpa [#allocation12], 1 }
 0x700   :  { %1256 = vsyncpa [#allocation15], 1 }
 0x701   :  { %1257 = vsyncpa [#allocation18], 1 }
 0x702   :  { %1258 = vsyncpa [#allocation4], 1 }
 0x703   :  { %1259 = vsyncpa [#allocation21], 1 }

</bundles_post_ra>
